<compile_context>
chip_gen: v6e
topology: v6e:2x2x1
jax: 0.10.0
libtpu: 0.0.40
codegen_flags: <defaults>
</compile_context>

<pallas_src>
import functools

import numpy as np

import jax
import jax.numpy as jnp
from jax.experimental import pallas as pl
from jax.experimental.pallas import tpu as pltpu

_LANE = 128


def _round_up(a, b):
    return (a + b - 1) // b * b


def _tensorcores_per_chip():
    """Best-effort detection of TensorCores per chip (grid sharding choice)."""
    try:
        kind = jax.devices()[0].device_kind.lower()
    except Exception:  # pragma: no cover
        return 1
    # v5e / v6e ("lite") have a single TensorCore; v4 / v5p / v7x expose two
    # (megacore / dual-TC) which we feed via a parallel grid axis.
    if "lite" in kind or "v5e" in kind or "v6e" in kind:
        return 1
    return 2


def _reflect_index(idx, n):
    """PyTorch 'reflect' padding index map (edge not repeated)."""
    idx = np.where(idx < 0, -idx, idx)
    idx = np.where(idx > n - 1, 2 * (n - 1) - idx, idx)
    return idx


def _selection_matrix(H, W, up, Wp, Lin):
    """One-hot (H*W, Lin) matrix mapping the flat raw image to the flat
    upsampled + reflect-padded image with row stride Wp.  Junk/tail columns are
    all-zero, so they come out exactly 0."""
    Hu, Wu = H * up, W * up
    Hp, Wreal = Hu + 2, Wu + 2
    r_src = _reflect_index(np.arange(Hp) - 1, Hu) // up          # (Hp,)
    c_src = _reflect_index(np.arange(Wreal) - 1, Wu) // up       # (Wreal,)
    rows = np.repeat(r_src, Wreal) * W + np.tile(c_src, Hp)      # source flat
    cols = np.repeat(np.arange(Hp), Wreal) * Wp + np.tile(np.arange(Wreal), Hp)
    M = np.zeros((H * W, Lin), np.float32)
    M[rows, cols] = 1.0
    return M


def _make_kernel(Wp, KH, KW, n_valid, eps=1e-5):
    inv_n = 1.0 / float(n_valid)

    def kernel(x_ref, w_ref, gb_ref, mask_ref, out_ref):
        """Fused 3x3 conv + InstanceNorm2d over a block of `nb` images.

        x_ref:    (nb, Cin, Lin)   flattened upsampled+reflect-padded images
        w_ref:    (Cout, KH*KW*Cin)
        gb_ref:   (Cout, 2)        [:,0]=gamma, [:,1]=beta
        mask_ref: (1, Lout)        1.0 on real output pixels (col%Wp < Wo)
        out_ref:  (nb, Cout, Lout) Lout = Ho*Wp, lane aligned
        """
        nb, Cin, Lin = x_ref.shape
        _, Cout, Lout = out_ref.shape

        w_all = w_ref[...].astype(jnp.float32)        # (Cout, 9*Cin), 1 vreg
        mask = mask_ref[...].astype(jnp.float32)      # (1, Lout)
        gamma = gb_ref[:, 0:1].astype(jnp.float32)    # (Cout, 1)
        beta = gb_ref[:, 1:2].astype(jnp.float32)

        for b in range(nb):                           # nb is 1 or 2 (static)
            x_img = x_ref[b].astype(jnp.float32)      # (Cin, Lin), lane dense
            acc = jnp.zeros((Cout, Lout), jnp.float32)
            # 9 shifted windows; each shift is a full-width XLU rotate followed
            # by a lane-ALIGNED [:Lout] slice (no realignment copies).  The
            # rolled window is created and consumed inside the tap iteration to
            # keep live ranges short.
            for kh in range(KH):
                for kw in range(KW):
                    s = kh * Wp + kw
                    shifted = pltpu.roll(x_img, shift=Lin - s, axis=1) if s else x_img
                    xs = shifted[:, :Lout]            # (Cin, Lout)
                    for ci in range(Cin):
                        tap = (kh * KW + kw) * Cin + ci
                        acc = acc + w_all[:, tap:tap + 1] * xs[ci:ci + 1, :]
            # conv bias intentionally omitted: a per-channel constant is exactly
            # cancelled by InstanceNorm's per-channel mean subtraction.

            # InstanceNorm2d, two-pass over the valid lanes (junk cols masked).
            mean = jnp.sum(acc * mask, axis=1, keepdims=True) * inv_n
            cen = acc - mean
            var = jnp.sum(cen * cen * mask, axis=1, keepdims=True) * inv_n
            scale = jax.lax.rsqrt(var + eps) * gamma
            out_ref[b] = (cen * scale + beta).astype(out_ref.dtype)

    return kernel


@functools.partial(jax.jit, static_argnames=("upsample",))
def upsample_conv_layer(x, weight, bias, gamma, beta, *, upsample=2):
    """Forward of UpsampleConvLayer(kernel=3, stride=1, reflect pad=1, InstanceNorm).

    x: (N, Cin, H, W) NCHW, weight: (Cout, Cin, 3, 3) OIHW.
    Returns (N, Cout, H*upsample, W*upsample) NCHW.
    """
    del bias  # mathematically cancelled by the InstanceNorm mean subtraction
    N, Cin, H, W = x.shape
    Cout, _, KH, KW = weight.shape
    assert (KH, KW) == (3, 3), "kernel assumes 3x3 conv with reflect pad 1"

    up = int(upsample) if upsample else 1
    Hu, Wu = H * up, W * up
    Ho, Wo = Hu, Wu                                    # stride 1, k=3, pad=1

    # Lane-aligned flat layout: row stride Wp >= Wu+2 chosen so Lout = Ho*Wp is
    # a multiple of 128 -> unmasked stores, full-width vreg ops.
    Wp = Wu + 2
    while (Ho * Wp) % _LANE != 0:
        Wp += 1
    Lout = Ho * Wp
    Lin = _round_up(Lout + (KH - 1) * Wp + (KW - 1), _LANE)

    # --- single pre-kernel op: upsample + reflect pad + flatten + lane pad ---
    # One-hot selection matmul (exact with HIGHEST precision); replaces the old
    # repeat/repeat/pad/reshape/pad chain.
    M = jnp.asarray(_selection_matrix(H, W, up, Wp, Lin))          # (H*W, Lin)
    xp_flat = jnp.einsum("ncp,pq->ncq", x.reshape(N, Cin, H * W), M,
                         precision=jax.lax.Precision.HIGHEST)      # (N,Cin,Lin)

    # kernel-side parameter layouts
    w_k = jnp.transpose(weight, (0, 2, 3, 1)).reshape(Cout, KH * KW * Cin)
    gb = jnp.stack([gamma, beta], axis=-1)                         # (Cout, 2)
    mask = jnp.asarray(((np.arange(Lout) % Wp) < Wo)
                       .astype(np.float32).reshape(1, Lout))       # tiny, fetched once

    # grid: per-image steps on dual-TC chips (v4/v5p/v7x), whole batch in one
    # step on single-TC chips (v5e/v6e) so the grid loop is not pure overhead.
    cores = _tensorcores_per_chip()
    nb = N if cores == 1 else 1
    grid = (N // nb,)

    kernel = _make_kernel(Wp, KH, KW, n_valid=Ho * Wo)

    out_flat = pl.pallas_call(
        kernel,
        out_shape=jax.ShapeDtypeStruct((N, Cout, Lout), x.dtype),
        grid_spec=pltpu.PrefetchScalarGridSpec(
            num_scalar_prefetch=0,
            grid=grid,
            in_specs=[
                pl.BlockSpec((nb, Cin, Lin), lambda n: (n, 0, 0)),
                pl.BlockSpec((Cout, KH * KW * Cin), lambda n: (0, 0)),
                pl.BlockSpec((Cout, 2), lambda n: (0, 0)),
                pl.BlockSpec((1, Lout), lambda n: (0, 0)),
            ],
            out_specs=pl.BlockSpec((nb, Cout, Lout), lambda n: (n, 0, 0)),
        ),
        compiler_params=pltpu.CompilerParams(
            dimension_semantics=("parallel",)),
    )(xp_flat, w_k, gb, mask)

    # Un-flatten (free) and crop the Wp-Wo junk columns.  If the downstream
    # consumer can take the lane-padded (N, Cout, Ho, Wp) layout, skip this
    # slice and fuse the crop into the next op instead.
    out = out_flat.reshape(N, Cout, Ho, Wp)[:, :, :, :Wo]
    return out


def _reference_forward(x, weight, bias, gamma, beta, *, upsample=2):
    """Pure-JAX reference matching the PyTorch module (includes the conv bias)."""
    if upsample and upsample > 1:
        x = jnp.repeat(x, upsample, axis=2)
        x = jnp.repeat(x, upsample, axis=3)
    xp = jnp.pad(x, ((0, 0), (0, 0), (1, 1), (1, 1)), mode="reflect")
    y = jax.lax.conv_general_dilated(
        xp, weight, window_strides=(1, 1), padding="VALID",
        dimension_numbers=("NCHW", "OIHW", "NCHW"),
        precision=jax.lax.Precision.HIGHEST)
    y = y + bias.reshape(1, -1, 1, 1)
    mean = jnp.mean(y, axis=(2, 3), keepdims=True)
    var = jnp.mean((y - mean) ** 2, axis=(2, 3), keepdims=True)
    yn = (y - mean) * jax.lax.rsqrt(var + 1e-5)
    return yn * gamma.reshape(1, -1, 1, 1) + beta.reshape(1, -1, 1, 1)


if __name__ == "__main__":
    key = jax.random.PRNGKey(0)
    k_x, k_w, k_b = jax.random.split(key, 3)

    # module config: in_channels=4, out_channels=8, kernel_size=3, stride=1,
    # upsample=2, norm_type='instance'
    N, Cin, H, W = 2, 4, 16, 16
    Cout, K = 8, 3

    x = jax.random.normal(k_x, (N, Cin, H, W), dtype=jnp.float32)

    # deterministic parameter init (synthetic, not a checkpoint)
    fan_in = Cin * K * K
    bound = 1.0 / (fan_in ** 0.5)
    weight = jax.random.uniform(k_w, (Cout, Cin, K, K), jnp.float32, -bound, bound)
    bias = jax.random.uniform(k_b, (Cout,), jnp.float32, -bound, bound)
    gamma = jnp.ones((Cout,), jnp.float32)   # InstanceNorm2d affine init
    beta = jnp.zeros((Cout,), jnp.float32)

    out = upsample_conv_layer(x, weight, bias, gamma, beta, upsample=2)
    out = jax.block_until_ready(out)
    assert out.shape == (N, Cout, H * 2, W * 2), out.shape

    ref = jax.block_until_ready(
        _reference_forward(x, weight, bias, gamma, beta, upsample=2))
    err = float(jnp.max(jnp.abs(out - ref)))
    assert err < 2e-3, f"max abs err vs reference: {err}"
    print("KERNEL_OK")
</pallas_src>

<mosaic_0001>
module attributes {stable_mosaic.version = 11 : i64} {
  func.func @kernel(%arg0: i32, %arg1: memref<1x4x1280xf32, #tpu.memory_space<vmem>>, %arg2: memref<8x36xf32, #tpu.memory_space<vmem>>, %arg3: memref<8x2xf32, #tpu.memory_space<vmem>>, %arg4: memref<1x1152xf32, #tpu.memory_space<vmem>>, %arg5: memref<1x8x1152xf32, #tpu.memory_space<vmem>>) attributes {dimension_semantics = [#tpu.dimension_semantics<parallel>], iteration_bounds = array<i64: 2>, scalar_prefetch = 0 : i64, scratch_operands = 0 : i64, tpu.core_type = #tpu.core_type<tc>, window_params = [{transform_indices = @transform_0, window_bounds = array<i64: 1, 4, 1280>}, {pipeline_mode = #tpu.pipeline_mode<synchronous>, transform_indices = @transform_1, window_bounds = array<i64: 8, 36>}, {pipeline_mode = #tpu.pipeline_mode<synchronous>, transform_indices = @transform_2, window_bounds = array<i64: 8, 2>}, {pipeline_mode = #tpu.pipeline_mode<synchronous>, transform_indices = @transform_3, window_bounds = array<i64: 1, 1152>}, {transform_indices = @transform_4, window_bounds = array<i64: 1, 8, 1152>}]} {
    %c0 = arith.constant 0 : index
    %c0_0 = arith.constant 0 : index
    %0 = vector.load %arg2[%c0, %c0_0] : memref<8x36xf32, #tpu.memory_space<vmem>>, vector<8x36xf32>
    %c0_1 = arith.constant 0 : index
    %c0_2 = arith.constant 0 : index
    %1 = vector.load %arg4[%c0_1, %c0_2] : memref<1x1152xf32, #tpu.memory_space<vmem>>, vector<1x1152xf32>
    %c0_3 = arith.constant 0 : index
    %c0_4 = arith.constant 0 : index
    %2 = vector.load %arg3[%c0_3, %c0_4] : memref<8x2xf32, #tpu.memory_space<vmem>>, vector<8x1xf32>
    %c0_5 = arith.constant 0 : index
    %c1 = arith.constant 1 : index
    %3 = vector.load %arg3[%c0_5, %c1] : memref<8x2xf32, #tpu.memory_space<vmem>>, vector<8x1xf32>
    %c0_6 = arith.constant 0 : index
    %c0_7 = arith.constant 0 : index
    %c0_8 = arith.constant 0 : index
    %4 = vector.load %arg1[%c0_6, %c0_7, %c0_8] : memref<1x4x1280xf32, #tpu.memory_space<vmem>>, vector<1x4x1280xf32>
    %5 = vector.shape_cast %4 : vector<1x4x1280xf32> to vector<4x1280xf32>
    %cst = arith.constant 0.000000e+00 : f32
    %6 = vector.broadcast %cst : f32 to vector<8x1152xf32>
    %7 = vector.extract_strided_slice %5 {offsets = [0, 0], sizes = [4, 1152], strides = [1, 1]} : vector<4x1280xf32> to vector<4x1152xf32>
    %8 = vector.extract_strided_slice %0 {offsets = [0, 0], sizes = [8, 1], strides = [1, 1]} : vector<8x36xf32> to vector<8x1xf32>
    %9 = vector.extract_strided_slice %7 {offsets = [0, 0], sizes = [1, 1152], strides = [1, 1]} : vector<4x1152xf32> to vector<1x1152xf32>
    %10 = vector.broadcast %8 : vector<8x1xf32> to vector<8x1152xf32>
    %11 = vector.broadcast %9 : vector<1x1152xf32> to vector<8x1152xf32>
    %12 = arith.mulf %10, %11 : vector<8x1152xf32>
    %13 = arith.addf %6, %12 : vector<8x1152xf32>
    %14 = vector.extract_strided_slice %0 {offsets = [0, 1], sizes = [8, 1], strides = [1, 1]} : vector<8x36xf32> to vector<8x1xf32>
    %15 = vector.extract_strided_slice %7 {offsets = [1, 0], sizes = [1, 1152], strides = [1, 1]} : vector<4x1152xf32> to vector<1x1152xf32>
    %16 = vector.broadcast %14 : vector<8x1xf32> to vector<8x1152xf32>
    %17 = vector.broadcast %15 : vector<1x1152xf32> to vector<8x1152xf32>
    %18 = arith.mulf %16, %17 : vector<8x1152xf32>
    %19 = arith.addf %13, %18 : vector<8x1152xf32>
    %20 = vector.extract_strided_slice %0 {offsets = [0, 2], sizes = [8, 1], strides = [1, 1]} : vector<8x36xf32> to vector<8x1xf32>
    %21 = vector.extract_strided_slice %7 {offsets = [2, 0], sizes = [1, 1152], strides = [1, 1]} : vector<4x1152xf32> to vector<1x1152xf32>
    %22 = vector.broadcast %20 : vector<8x1xf32> to vector<8x1152xf32>
    %23 = vector.broadcast %21 : vector<1x1152xf32> to vector<8x1152xf32>
    %24 = arith.mulf %22, %23 : vector<8x1152xf32>
    %25 = arith.addf %19, %24 : vector<8x1152xf32>
    %26 = vector.extract_strided_slice %0 {offsets = [0, 3], sizes = [8, 1], strides = [1, 1]} : vector<8x36xf32> to vector<8x1xf32>
    %27 = vector.extract_strided_slice %7 {offsets = [3, 0], sizes = [1, 1152], strides = [1, 1]} : vector<4x1152xf32> to vector<1x1152xf32>
    %28 = vector.broadcast %26 : vector<8x1xf32> to vector<8x1152xf32>
    %29 = vector.broadcast %27 : vector<1x1152xf32> to vector<8x1152xf32>
    %30 = arith.mulf %28, %29 : vector<8x1152xf32>
    %31 = arith.addf %25, %30 : vector<8x1152xf32>
    %c1279_i32 = arith.constant 1279 : i32
    %32 = tpu.dynamic_rotate %5 by %c1279_i32 dim 1 : vector<4x1280xf32>, i32 -> vector<4x1280xf32>
    %33 = vector.extract_strided_slice %32 {offsets = [0, 0], sizes = [4, 1152], strides = [1, 1]} : vector<4x1280xf32> to vector<4x1152xf32>
    %34 = vector.extract_strided_slice %0 {offsets = [0, 4], sizes = [8, 1], strides = [1, 1]} : vector<8x36xf32> to vector<8x1xf32>
    %35 = vector.extract_strided_slice %33 {offsets = [0, 0], sizes = [1, 1152], strides = [1, 1]} : vector<4x1152xf32> to vector<1x1152xf32>
    %36 = vector.broadcast %34 : vector<8x1xf32> to vector<8x1152xf32>
    %37 = vector.broadcast %35 : vector<1x1152xf32> to vector<8x1152xf32>
    %38 = arith.mulf %36, %37 : vector<8x1152xf32>
    %39 = arith.addf %31, %38 : vector<8x1152xf32>
    %40 = vector.extract_strided_slice %0 {offsets = [0, 5], sizes = [8, 1], strides = [1, 1]} : vector<8x36xf32> to vector<8x1xf32>
    %41 = vector.extract_strided_slice %33 {offsets = [1, 0], sizes = [1, 1152], strides = [1, 1]} : vector<4x1152xf32> to vector<1x1152xf32>
    %42 = vector.broadcast %40 : vector<8x1xf32> to vector<8x1152xf32>
    %43 = vector.broadcast %41 : vector<1x1152xf32> to vector<8x1152xf32>
    %44 = arith.mulf %42, %43 : vector<8x1152xf32>
    %45 = arith.addf %39, %44 : vector<8x1152xf32>
    %46 = vector.extract_strided_slice %0 {offsets = [0, 6], sizes = [8, 1], strides = [1, 1]} : vector<8x36xf32> to vector<8x1xf32>
    %47 = vector.extract_strided_slice %33 {offsets = [2, 0], sizes = [1, 1152], strides = [1, 1]} : vector<4x1152xf32> to vector<1x1152xf32>
    %48 = vector.broadcast %46 : vector<8x1xf32> to vector<8x1152xf32>
    %49 = vector.broadcast %47 : vector<1x1152xf32> to vector<8x1152xf32>
    %50 = arith.mulf %48, %49 : vector<8x1152xf32>
    %51 = arith.addf %45, %50 : vector<8x1152xf32>
    %52 = vector.extract_strided_slice %0 {offsets = [0, 7], sizes = [8, 1], strides = [1, 1]} : vector<8x36xf32> to vector<8x1xf32>
    %53 = vector.extract_strided_slice %33 {offsets = [3, 0], sizes = [1, 1152], strides = [1, 1]} : vector<4x1152xf32> to vector<1x1152xf32>
    %54 = vector.broadcast %52 : vector<8x1xf32> to vector<8x1152xf32>
    %55 = vector.broadcast %53 : vector<1x1152xf32> to vector<8x1152xf32>
    %56 = arith.mulf %54, %55 : vector<8x1152xf32>
    %57 = arith.addf %51, %56 : vector<8x1152xf32>
    %c1278_i32 = arith.constant 1278 : i32
    %58 = tpu.dynamic_rotate %5 by %c1278_i32 dim 1 : vector<4x1280xf32>, i32 -> vector<4x1280xf32>
    %59 = vector.extract_strided_slice %58 {offsets = [0, 0], sizes = [4, 1152], strides = [1, 1]} : vector<4x1280xf32> to vector<4x1152xf32>
    %60 = vector.extract_strided_slice %0 {offsets = [0, 8], sizes = [8, 1], strides = [1, 1]} : vector<8x36xf32> to vector<8x1xf32>
    %61 = vector.extract_strided_slice %59 {offsets = [0, 0], sizes = [1, 1152], strides = [1, 1]} : vector<4x1152xf32> to vector<1x1152xf32>
    %62 = vector.broadcast %60 : vector<8x1xf32> to vector<8x1152xf32>
    %63 = vector.broadcast %61 : vector<1x1152xf32> to vector<8x1152xf32>
    %64 = arith.mulf %62, %63 : vector<8x1152xf32>
    %65 = arith.addf %57, %64 : vector<8x1152xf32>
    %66 = vector.extract_strided_slice %0 {offsets = [0, 9], sizes = [8, 1], strides = [1, 1]} : vector<8x36xf32> to vector<8x1xf32>
    %67 = vector.extract_strided_slice %59 {offsets = [1, 0], sizes = [1, 1152], strides = [1, 1]} : vector<4x1152xf32> to vector<1x1152xf32>
    %68 = vector.broadcast %66 : vector<8x1xf32> to vector<8x1152xf32>
    %69 = vector.broadcast %67 : vector<1x1152xf32> to vector<8x1152xf32>
    %70 = arith.mulf %68, %69 : vector<8x1152xf32>
    %71 = arith.addf %65, %70 : vector<8x1152xf32>
    %72 = vector.extract_strided_slice %0 {offsets = [0, 10], sizes = [8, 1], strides = [1, 1]} : vector<8x36xf32> to vector<8x1xf32>
    %73 = vector.extract_strided_slice %59 {offsets = [2, 0], sizes = [1, 1152], strides = [1, 1]} : vector<4x1152xf32> to vector<1x1152xf32>
    %74 = vector.broadcast %72 : vector<8x1xf32> to vector<8x1152xf32>
    %75 = vector.broadcast %73 : vector<1x1152xf32> to vector<8x1152xf32>
    %76 = arith.mulf %74, %75 : vector<8x1152xf32>
    %77 = arith.addf %71, %76 : vector<8x1152xf32>
    %78 = vector.extract_strided_slice %0 {offsets = [0, 11], sizes = [8, 1], strides = [1, 1]} : vector<8x36xf32> to vector<8x1xf32>
    %79 = vector.extract_strided_slice %59 {offsets = [3, 0], sizes = [1, 1152], strides = [1, 1]} : vector<4x1152xf32> to vector<1x1152xf32>
    %80 = vector.broadcast %78 : vector<8x1xf32> to vector<8x1152xf32>
    %81 = vector.broadcast %79 : vector<1x1152xf32> to vector<8x1152xf32>
    %82 = arith.mulf %80, %81 : vector<8x1152xf32>
    %83 = arith.addf %77, %82 : vector<8x1152xf32>
    %c1244_i32 = arith.constant 1244 : i32
    %84 = tpu.dynamic_rotate %5 by %c1244_i32 dim 1 : vector<4x1280xf32>, i32 -> vector<4x1280xf32>
    %85 = vector.extract_strided_slice %84 {offsets = [0, 0], sizes = [4, 1152], strides = [1, 1]} : vector<4x1280xf32> to vector<4x1152xf32>
    %86 = vector.extract_strided_slice %0 {offsets = [0, 12], sizes = [8, 1], strides = [1, 1]} : vector<8x36xf32> to vector<8x1xf32>
    %87 = vector.extract_strided_slice %85 {offsets = [0, 0], sizes = [1, 1152], strides = [1, 1]} : vector<4x1152xf32> to vector<1x1152xf32>
    %88 = vector.broadcast %86 : vector<8x1xf32> to vector<8x1152xf32>
    %89 = vector.broadcast %87 : vector<1x1152xf32> to vector<8x1152xf32>
    %90 = arith.mulf %88, %89 : vector<8x1152xf32>
    %91 = arith.addf %83, %90 : vector<8x1152xf32>
    %92 = vector.extract_strided_slice %0 {offsets = [0, 13], sizes = [8, 1], strides = [1, 1]} : vector<8x36xf32> to vector<8x1xf32>
    %93 = vector.extract_strided_slice %85 {offsets = [1, 0], sizes = [1, 1152], strides = [1, 1]} : vector<4x1152xf32> to vector<1x1152xf32>
    %94 = vector.broadcast %92 : vector<8x1xf32> to vector<8x1152xf32>
    %95 = vector.broadcast %93 : vector<1x1152xf32> to vector<8x1152xf32>
    %96 = arith.mulf %94, %95 : vector<8x1152xf32>
    %97 = arith.addf %91, %96 : vector<8x1152xf32>
    %98 = vector.extract_strided_slice %0 {offsets = [0, 14], sizes = [8, 1], strides = [1, 1]} : vector<8x36xf32> to vector<8x1xf32>
    %99 = vector.extract_strided_slice %85 {offsets = [2, 0], sizes = [1, 1152], strides = [1, 1]} : vector<4x1152xf32> to vector<1x1152xf32>
    %100 = vector.broadcast %98 : vector<8x1xf32> to vector<8x1152xf32>
    %101 = vector.broadcast %99 : vector<1x1152xf32> to vector<8x1152xf32>
    %102 = arith.mulf %100, %101 : vector<8x1152xf32>
    %103 = arith.addf %97, %102 : vector<8x1152xf32>
    %104 = vector.extract_strided_slice %0 {offsets = [0, 15], sizes = [8, 1], strides = [1, 1]} : vector<8x36xf32> to vector<8x1xf32>
    %105 = vector.extract_strided_slice %85 {offsets = [3, 0], sizes = [1, 1152], strides = [1, 1]} : vector<4x1152xf32> to vector<1x1152xf32>
    %106 = vector.broadcast %104 : vector<8x1xf32> to vector<8x1152xf32>
    %107 = vector.broadcast %105 : vector<1x1152xf32> to vector<8x1152xf32>
    %108 = arith.mulf %106, %107 : vector<8x1152xf32>
    %109 = arith.addf %103, %108 : vector<8x1152xf32>
    %c1243_i32 = arith.constant 1243 : i32
    %110 = tpu.dynamic_rotate %5 by %c1243_i32 dim 1 : vector<4x1280xf32>, i32 -> vector<4x1280xf32>
    %111 = vector.extract_strided_slice %110 {offsets = [0, 0], sizes = [4, 1152], strides = [1, 1]} : vector<4x1280xf32> to vector<4x1152xf32>
    %112 = vector.extract_strided_slice %0 {offsets = [0, 16], sizes = [8, 1], strides = [1, 1]} : vector<8x36xf32> to vector<8x1xf32>
    %113 = vector.extract_strided_slice %111 {offsets = [0, 0], sizes = [1, 1152], strides = [1, 1]} : vector<4x1152xf32> to vector<1x1152xf32>
    %114 = vector.broadcast %112 : vector<8x1xf32> to vector<8x1152xf32>
    %115 = vector.broadcast %113 : vector<1x1152xf32> to vector<8x1152xf32>
    %116 = arith.mulf %114, %115 : vector<8x1152xf32>
    %117 = arith.addf %109, %116 : vector<8x1152xf32>
    %118 = vector.extract_strided_slice %0 {offsets = [0, 17], sizes = [8, 1], strides = [1, 1]} : vector<8x36xf32> to vector<8x1xf32>
    %119 = vector.extract_strided_slice %111 {offsets = [1, 0], sizes = [1, 1152], strides = [1, 1]} : vector<4x1152xf32> to vector<1x1152xf32>
    %120 = vector.broadcast %118 : vector<8x1xf32> to vector<8x1152xf32>
    %121 = vector.broadcast %119 : vector<1x1152xf32> to vector<8x1152xf32>
    %122 = arith.mulf %120, %121 : vector<8x1152xf32>
    %123 = arith.addf %117, %122 : vector<8x1152xf32>
    %124 = vector.extract_strided_slice %0 {offsets = [0, 18], sizes = [8, 1], strides = [1, 1]} : vector<8x36xf32> to vector<8x1xf32>
    %125 = vector.extract_strided_slice %111 {offsets = [2, 0], sizes = [1, 1152], strides = [1, 1]} : vector<4x1152xf32> to vector<1x1152xf32>
    %126 = vector.broadcast %124 : vector<8x1xf32> to vector<8x1152xf32>
    %127 = vector.broadcast %125 : vector<1x1152xf32> to vector<8x1152xf32>
    %128 = arith.mulf %126, %127 : vector<8x1152xf32>
    %129 = arith.addf %123, %128 : vector<8x1152xf32>
    %130 = vector.extract_strided_slice %0 {offsets = [0, 19], sizes = [8, 1], strides = [1, 1]} : vector<8x36xf32> to vector<8x1xf32>
    %131 = vector.extract_strided_slice %111 {offsets = [3, 0], sizes = [1, 1152], strides = [1, 1]} : vector<4x1152xf32> to vector<1x1152xf32>
    %132 = vector.broadcast %130 : vector<8x1xf32> to vector<8x1152xf32>
    %133 = vector.broadcast %131 : vector<1x1152xf32> to vector<8x1152xf32>
    %134 = arith.mulf %132, %133 : vector<8x1152xf32>
    %135 = arith.addf %129, %134 : vector<8x1152xf32>
    %c1242_i32 = arith.constant 1242 : i32
    %136 = tpu.dynamic_rotate %5 by %c1242_i32 dim 1 : vector<4x1280xf32>, i32 -> vector<4x1280xf32>
    %137 = vector.extract_strided_slice %136 {offsets = [0, 0], sizes = [4, 1152], strides = [1, 1]} : vector<4x1280xf32> to vector<4x1152xf32>
    %138 = vector.extract_strided_slice %0 {offsets = [0, 20], sizes = [8, 1], strides = [1, 1]} : vector<8x36xf32> to vector<8x1xf32>
    %139 = vector.extract_strided_slice %137 {offsets = [0, 0], sizes = [1, 1152], strides = [1, 1]} : vector<4x1152xf32> to vector<1x1152xf32>
    %140 = vector.broadcast %138 : vector<8x1xf32> to vector<8x1152xf32>
    %141 = vector.broadcast %139 : vector<1x1152xf32> to vector<8x1152xf32>
    %142 = arith.mulf %140, %141 : vector<8x1152xf32>
    %143 = arith.addf %135, %142 : vector<8x1152xf32>
    %144 = vector.extract_strided_slice %0 {offsets = [0, 21], sizes = [8, 1], strides = [1, 1]} : vector<8x36xf32> to vector<8x1xf32>
    %145 = vector.extract_strided_slice %137 {offsets = [1, 0], sizes = [1, 1152], strides = [1, 1]} : vector<4x1152xf32> to vector<1x1152xf32>
    %146 = vector.broadcast %144 : vector<8x1xf32> to vector<8x1152xf32>
    %147 = vector.broadcast %145 : vector<1x1152xf32> to vector<8x1152xf32>
    %148 = arith.mulf %146, %147 : vector<8x1152xf32>
    %149 = arith.addf %143, %148 : vector<8x1152xf32>
    %150 = vector.extract_strided_slice %0 {offsets = [0, 22], sizes = [8, 1], strides = [1, 1]} : vector<8x36xf32> to vector<8x1xf32>
    %151 = vector.extract_strided_slice %137 {offsets = [2, 0], sizes = [1, 1152], strides = [1, 1]} : vector<4x1152xf32> to vector<1x1152xf32>
    %152 = vector.broadcast %150 : vector<8x1xf32> to vector<8x1152xf32>
    %153 = vector.broadcast %151 : vector<1x1152xf32> to vector<8x1152xf32>
    %154 = arith.mulf %152, %153 : vector<8x1152xf32>
    %155 = arith.addf %149, %154 : vector<8x1152xf32>
    %156 = vector.extract_strided_slice %0 {offsets = [0, 23], sizes = [8, 1], strides = [1, 1]} : vector<8x36xf32> to vector<8x1xf32>
    %157 = vector.extract_strided_slice %137 {offsets = [3, 0], sizes = [1, 1152], strides = [1, 1]} : vector<4x1152xf32> to vector<1x1152xf32>
    %158 = vector.broadcast %156 : vector<8x1xf32> to vector<8x1152xf32>
    %159 = vector.broadcast %157 : vector<1x1152xf32> to vector<8x1152xf32>
    %160 = arith.mulf %158, %159 : vector<8x1152xf32>
    %161 = arith.addf %155, %160 : vector<8x1152xf32>
    %c1208_i32 = arith.constant 1208 : i32
    %162 = tpu.dynamic_rotate %5 by %c1208_i32 dim 1 : vector<4x1280xf32>, i32 -> vector<4x1280xf32>
    %163 = vector.extract_strided_slice %162 {offsets = [0, 0], sizes = [4, 1152], strides = [1, 1]} : vector<4x1280xf32> to vector<4x1152xf32>
    %164 = vector.extract_strided_slice %0 {offsets = [0, 24], sizes = [8, 1], strides = [1, 1]} : vector<8x36xf32> to vector<8x1xf32>
    %165 = vector.extract_strided_slice %163 {offsets = [0, 0], sizes = [1, 1152], strides = [1, 1]} : vector<4x1152xf32> to vector<1x1152xf32>
    %166 = vector.broadcast %164 : vector<8x1xf32> to vector<8x1152xf32>
    %167 = vector.broadcast %165 : vector<1x1152xf32> to vector<8x1152xf32>
    %168 = arith.mulf %166, %167 : vector<8x1152xf32>
    %169 = arith.addf %161, %168 : vector<8x1152xf32>
    %170 = vector.extract_strided_slice %0 {offsets = [0, 25], sizes = [8, 1], strides = [1, 1]} : vector<8x36xf32> to vector<8x1xf32>
    %171 = vector.extract_strided_slice %163 {offsets = [1, 0], sizes = [1, 1152], strides = [1, 1]} : vector<4x1152xf32> to vector<1x1152xf32>
    %172 = vector.broadcast %170 : vector<8x1xf32> to vector<8x1152xf32>
    %173 = vector.broadcast %171 : vector<1x1152xf32> to vector<8x1152xf32>
    %174 = arith.mulf %172, %173 : vector<8x1152xf32>
    %175 = arith.addf %169, %174 : vector<8x1152xf32>
    %176 = vector.extract_strided_slice %0 {offsets = [0, 26], sizes = [8, 1], strides = [1, 1]} : vector<8x36xf32> to vector<8x1xf32>
    %177 = vector.extract_strided_slice %163 {offsets = [2, 0], sizes = [1, 1152], strides = [1, 1]} : vector<4x1152xf32> to vector<1x1152xf32>
    %178 = vector.broadcast %176 : vector<8x1xf32> to vector<8x1152xf32>
    %179 = vector.broadcast %177 : vector<1x1152xf32> to vector<8x1152xf32>
    %180 = arith.mulf %178, %179 : vector<8x1152xf32>
    %181 = arith.addf %175, %180 : vector<8x1152xf32>
    %182 = vector.extract_strided_slice %0 {offsets = [0, 27], sizes = [8, 1], strides = [1, 1]} : vector<8x36xf32> to vector<8x1xf32>
    %183 = vector.extract_strided_slice %163 {offsets = [3, 0], sizes = [1, 1152], strides = [1, 1]} : vector<4x1152xf32> to vector<1x1152xf32>
    %184 = vector.broadcast %182 : vector<8x1xf32> to vector<8x1152xf32>
    %185 = vector.broadcast %183 : vector<1x1152xf32> to vector<8x1152xf32>
    %186 = arith.mulf %184, %185 : vector<8x1152xf32>
    %187 = arith.addf %181, %186 : vector<8x1152xf32>
    %c1207_i32 = arith.constant 1207 : i32
    %188 = tpu.dynamic_rotate %5 by %c1207_i32 dim 1 : vector<4x1280xf32>, i32 -> vector<4x1280xf32>
    %189 = vector.extract_strided_slice %188 {offsets = [0, 0], sizes = [4, 1152], strides = [1, 1]} : vector<4x1280xf32> to vector<4x1152xf32>
    %190 = vector.extract_strided_slice %0 {offsets = [0, 28], sizes = [8, 1], strides = [1, 1]} : vector<8x36xf32> to vector<8x1xf32>
    %191 = vector.extract_strided_slice %189 {offsets = [0, 0], sizes = [1, 1152], strides = [1, 1]} : vector<4x1152xf32> to vector<1x1152xf32>
    %192 = vector.broadcast %190 : vector<8x1xf32> to vector<8x1152xf32>
    %193 = vector.broadcast %191 : vector<1x1152xf32> to vector<8x1152xf32>
    %194 = arith.mulf %192, %193 : vector<8x1152xf32>
    %195 = arith.addf %187, %194 : vector<8x1152xf32>
    %196 = vector.extract_strided_slice %0 {offsets = [0, 29], sizes = [8, 1], strides = [1, 1]} : vector<8x36xf32> to vector<8x1xf32>
    %197 = vector.extract_strided_slice %189 {offsets = [1, 0], sizes = [1, 1152], strides = [1, 1]} : vector<4x1152xf32> to vector<1x1152xf32>
    %198 = vector.broadcast %196 : vector<8x1xf32> to vector<8x1152xf32>
    %199 = vector.broadcast %197 : vector<1x1152xf32> to vector<8x1152xf32>
    %200 = arith.mulf %198, %199 : vector<8x1152xf32>
    %201 = arith.addf %195, %200 : vector<8x1152xf32>
    %202 = vector.extract_strided_slice %0 {offsets = [0, 30], sizes = [8, 1], strides = [1, 1]} : vector<8x36xf32> to vector<8x1xf32>
    %203 = vector.extract_strided_slice %189 {offsets = [2, 0], sizes = [1, 1152], strides = [1, 1]} : vector<4x1152xf32> to vector<1x1152xf32>
    %204 = vector.broadcast %202 : vector<8x1xf32> to vector<8x1152xf32>
    %205 = vector.broadcast %203 : vector<1x1152xf32> to vector<8x1152xf32>
    %206 = arith.mulf %204, %205 : vector<8x1152xf32>
    %207 = arith.addf %201, %206 : vector<8x1152xf32>
    %208 = vector.extract_strided_slice %0 {offsets = [0, 31], sizes = [8, 1], strides = [1, 1]} : vector<8x36xf32> to vector<8x1xf32>
    %209 = vector.extract_strided_slice %189 {offsets = [3, 0], sizes = [1, 1152], strides = [1, 1]} : vector<4x1152xf32> to vector<1x1152xf32>
    %210 = vector.broadcast %208 : vector<8x1xf32> to vector<8x1152xf32>
    %211 = vector.broadcast %209 : vector<1x1152xf32> to vector<8x1152xf32>
    %212 = arith.mulf %210, %211 : vector<8x1152xf32>
    %213 = arith.addf %207, %212 : vector<8x1152xf32>
    %c1206_i32 = arith.constant 1206 : i32
    %214 = tpu.dynamic_rotate %5 by %c1206_i32 dim 1 : vector<4x1280xf32>, i32 -> vector<4x1280xf32>
    %215 = vector.extract_strided_slice %214 {offsets = [0, 0], sizes = [4, 1152], strides = [1, 1]} : vector<4x1280xf32> to vector<4x1152xf32>
    %216 = vector.extract_strided_slice %0 {offsets = [0, 32], sizes = [8, 1], strides = [1, 1]} : vector<8x36xf32> to vector<8x1xf32>
    %217 = vector.extract_strided_slice %215 {offsets = [0, 0], sizes = [1, 1152], strides = [1, 1]} : vector<4x1152xf32> to vector<1x1152xf32>
    %218 = vector.broadcast %216 : vector<8x1xf32> to vector<8x1152xf32>
    %219 = vector.broadcast %217 : vector<1x1152xf32> to vector<8x1152xf32>
    %220 = arith.mulf %218, %219 : vector<8x1152xf32>
    %221 = arith.addf %213, %220 : vector<8x1152xf32>
    %222 = vector.extract_strided_slice %0 {offsets = [0, 33], sizes = [8, 1], strides = [1, 1]} : vector<8x36xf32> to vector<8x1xf32>
    %223 = vector.extract_strided_slice %215 {offsets = [1, 0], sizes = [1, 1152], strides = [1, 1]} : vector<4x1152xf32> to vector<1x1152xf32>
    %224 = vector.broadcast %222 : vector<8x1xf32> to vector<8x1152xf32>
    %225 = vector.broadcast %223 : vector<1x1152xf32> to vector<8x1152xf32>
    %226 = arith.mulf %224, %225 : vector<8x1152xf32>
    %227 = arith.addf %221, %226 : vector<8x1152xf32>
    %228 = vector.extract_strided_slice %0 {offsets = [0, 34], sizes = [8, 1], strides = [1, 1]} : vector<8x36xf32> to vector<8x1xf32>
    %229 = vector.extract_strided_slice %215 {offsets = [2, 0], sizes = [1, 1152], strides = [1, 1]} : vector<4x1152xf32> to vector<1x1152xf32>
    %230 = vector.broadcast %228 : vector<8x1xf32> to vector<8x1152xf32>
    %231 = vector.broadcast %229 : vector<1x1152xf32> to vector<8x1152xf32>
    %232 = arith.mulf %230, %231 : vector<8x1152xf32>
    %233 = arith.addf %227, %232 : vector<8x1152xf32>
    %234 = vector.extract_strided_slice %0 {offsets = [0, 35], sizes = [8, 1], strides = [1, 1]} : vector<8x36xf32> to vector<8x1xf32>
    %235 = vector.extract_strided_slice %215 {offsets = [3, 0], sizes = [1, 1152], strides = [1, 1]} : vector<4x1152xf32> to vector<1x1152xf32>
    %236 = vector.broadcast %234 : vector<8x1xf32> to vector<8x1152xf32>
    %237 = vector.broadcast %235 : vector<1x1152xf32> to vector<8x1152xf32>
    %238 = arith.mulf %236, %237 : vector<8x1152xf32>
    %239 = arith.addf %233, %238 : vector<8x1152xf32>
    %240 = vector.broadcast %1 : vector<1x1152xf32> to vector<8x1152xf32>
    %241 = arith.mulf %239, %240 : vector<8x1152xf32>
    %cst_9 = arith.constant dense<0.000000e+00> : vector<8xf32>
    %242 = vector.multi_reduction <add>, %241, %cst_9 [1] : vector<8x1152xf32> to vector<8xf32>
    %243 = vector.shape_cast %242 : vector<8xf32> to vector<8x1xf32>
    %cst_10 = arith.constant 9.765625E-4 : f32
    %244 = vector.broadcast %cst_10 : f32 to vector<8x1xf32>
    %245 = arith.mulf %243, %244 : vector<8x1xf32>
    %246 = vector.broadcast %245 : vector<8x1xf32> to vector<8x1152xf32>
    %247 = arith.subf %239, %246 : vector<8x1152xf32>
    %248 = arith.mulf %247, %247 : vector<8x1152xf32>
    %249 = vector.broadcast %1 : vector<1x1152xf32> to vector<8x1152xf32>
    %250 = arith.mulf %248, %249 : vector<8x1152xf32>
    %cst_11 = arith.constant dense<0.000000e+00> : vector<8xf32>
    %251 = vector.multi_reduction <add>, %250, %cst_11 [1] : vector<8x1152xf32> to vector<8xf32>
    %252 = vector.shape_cast %251 : vector<8xf32> to vector<8x1xf32>
    %cst_12 = arith.constant 9.765625E-4 : f32
    %253 = vector.broadcast %cst_12 : f32 to vector<8x1xf32>
    %254 = arith.mulf %252, %253 : vector<8x1xf32>
    %cst_13 = arith.constant 9.99999974E-6 : f32
    %255 = vector.broadcast %cst_13 : f32 to vector<8x1xf32>
    %256 = arith.addf %254, %255 : vector<8x1xf32>
    %257 = math.rsqrt %256 : vector<8x1xf32>
    %258 = arith.mulf %257, %2 : vector<8x1xf32>
    %259 = vector.broadcast %258 : vector<8x1xf32> to vector<8x1152xf32>
    %260 = arith.mulf %247, %259 : vector<8x1152xf32>
    %261 = vector.broadcast %3 : vector<8x1xf32> to vector<8x1152xf32>
    %262 = arith.addf %260, %261 : vector<8x1152xf32>
    %c0_14 = arith.constant 0 : index
    %c0_15 = arith.constant 0 : index
    %c0_16 = arith.constant 0 : index
    %263 = vector.load %arg5[%c0_14, %c0_15, %c0_16] : memref<1x8x1152xf32, #tpu.memory_space<vmem>>, vector<1x8x1152xf32>
    %264 = vector.shape_cast %263 : vector<1x8x1152xf32> to vector<8x1152xf32>
    %265 = vector.shape_cast %262 : vector<8x1152xf32> to vector<1x8x1152xf32>
    tpu.vector_store %arg5[%c0_14, %c0_15, %c0_16], %265 {strides = array<i32>} : memref<1x8x1152xf32, #tpu.memory_space<vmem>>, vector<1x8x1152xf32>,
    return
  }
  func.func @transform_0(%arg0: i32) -> (i32, i32, i32) {
    %c0_i32 = arith.constant 0 : i32
    %c0_i32_0 = arith.constant 0 : i32
    %c0_i32_1 = arith.constant 0 : i32
    return %arg0, %c0_i32, %c0_i32_0 : i32, i32, i32
  }
  func.func @transform_1(%arg0: i32) -> (i32, i32) {
    %c0_i32 = arith.constant 0 : i32
    %c0_i32_0 = arith.constant 0 : i32
    %c0_i32_1 = arith.constant 0 : i32
    return %c0_i32, %c0_i32_0 : i32, i32
  }
  func.func @transform_2(%arg0: i32) -> (i32, i32) {
    %c0_i32 = arith.constant 0 : i32
    %c0_i32_0 = arith.constant 0 : i32
    %c0_i32_1 = arith.constant 0 : i32
    return %c0_i32, %c0_i32_0 : i32, i32
  }
  func.func @transform_3(%arg0: i32) -> (i32, i32) {
    %c0_i32 = arith.constant 0 : i32
    %c0_i32_0 = arith.constant 0 : i32
    %c0_i32_1 = arith.constant 0 : i32
    return %c0_i32, %c0_i32_0 : i32, i32
  }
  func.func @transform_4(%arg0: i32) -> (i32, i32, i32) {
    %c0_i32 = arith.constant 0 : i32
    %c0_i32_0 = arith.constant 0 : i32
    %c0_i32_1 = arith.constant 0 : i32
    return %arg0, %c0_i32, %c0_i32_0 : i32, i32, i32
  }
}

</mosaic_0001>

<bundles_post_ra>
// kernel: upsample_conv_layer.1
= control target key start
LH: loop header
LB: loop body
LE: loop exit
PB: predicated region body
PF: predicated region fallthrough
CT: control target
= control target key end

     0   :  { %s3125_s15 = smov 0   ;;  %s4763_s0 = inlined_call_operand.vmem [shape: f32[2,4,1280], index: 0, kind: input, shape index: {}]   ;;  %s4764_s1 = inlined_call_operand.vmem [shape: f32[8,36], index: 1, kind: input, shape index: {}]   ;;  %s4765_s2 = inlined_call_operand.vmem [shape: f32[8,2], index: 2, kind: input, shape index: {}]   ;;  %s4766_s3 = inlined_call_operand.vmem [shape: f32[1,1152], index: 3, kind: input, shape index: {}]   ;;  %s4767_s4 = inlined_call_operand.vmem [shape: f32[2,8,1152], index: 4, kind: output, shape index: {}]  }
   0x1 LB: > { %s2933_s16 = sadd.s32 4294967295, %s3054_s15   ;;  %p2937_p0 = scmp.ge.s32.totalorder %s3054_s15, 1  ;;  %s3054_s15 = sphi %s3125_s15, %s14_s15  }
   0x2   : > { %p162_p1 = scmp.lt.s32.totalorder %s3054_s15, 3 }
   0x4   : > { %p163_p2 = pnand %p2937_p0, %p162_p1 }
   0x6   : > { %166 = sbr.rel (%p163_p2) target bundleno = 900 (0x384), region = 36 }
   0xb   : > { %v3136_v0 = vld [vmem:[%s4764_s1] sm:$0xff]  ;;  %p188_p3 = scmp.lt.s32.totalorder %s2933_s16, 1  ;;  %v3056_v1 = vmov 2   ;;  %v4769_v2 = vmov 0   ;;  %v3058_v3 = vmov 3   ;;  %v4768_v4 = vmov 1  }
   0xc   : > { %2999 = vset.pattern.permute.xlu1 %v3056_v1  ;;  %2997 = vset.pattern.permute.xlu0 %v4769_v2  ;;  %v3060_v6 = vmov 4   ;;  %s3061_s23 = smov 127   ;;  %v3062_v9 = vmov 9   ;;  %v3063_v11 = vmov 5   ;;  %v3064_v14 = vmov 6   ;;  %s3067_s24 = smov 126  }
   0xd   : > { %420 = vperm.xlu1 %2999, %v3136_v0   ;;  %209 = vperm.xlu0 %2997, %v3136_v0   ;;  %s4784_s16 = smov (!%p188_p3, %s2933_s16), 1  ;;  %v3065_v16 = vmov 7   ;;  %v3066_v17 = vmov 8   ;;  %v3068_v18 = vmov 10   ;;  %v3069_v20 = vmov 11   ;;  %s3071_s25 = smov 92  }
   0xe   : > { %s2943_s19 = smul.u32 40, %s4784_s16  ;;  %v3070_v22 = vmov 12   ;;  %v3072_v23 = vmov 13   ;;  %v3073_v25 = vmov 14   ;;  %v3074_v26 = vmov 15   ;;  %s3076_s26 = smov 91  }
   0xf   : > { %v3075_v27 = vmov 16   ;;  %v3077_v28 = vmov 17   ;;  %v3078_v29 = vmov 18   ;;  %v3079_v30 = vmov 19   ;;  %s3081_s27 = smov 90   ;;  %s3086_s28 = smov 56  }
  0x10   : > { %s3148_s22 = scalar_lea.vmem %s4763_s0, %s2943_s19  ;;  %v3080_v31 = vmov 20   ;;  %v217_v32 = vlaneseq  ;;  %v3082_v33 = vmov 21   ;;  %v3083_v45 = vmov 22   ;;  %s3091_s29 = smov 55  }
  0x11   : > { %3000 = vset.pattern.permute.xlu1 %v3058_v3  ;;  %2998 = vset.pattern.permute.xlu0 %v4768_v4  ;;  %v3153_v5 = vld [vmem:[%s3148_s22] sm:$0xff]  ;;  %v3159_v7 = vld [vmem:[%s3148_s22 + $0x8] sm:$0xff]  ;;  %v3177_v12 = vld [vmem:[%s3148_s22 + $0x10] sm:$0xff]  ;;  %v3084_v1 = vmov 23   ;;  %s3096_s30 = smov 54   ;;  %s2944_s11 = smul.u32 72, %s4784_s16 }
  0x12   : > { %523 = vperm.xlu1 %3000, %v3136_v0   ;;  %317 = vperm.xlu0 %2998, %v3136_v0   ;;  %v3163_v8 = vcombine.high %v3153_v5, %v3153_v5  ;;  %v3169_v10 = vcombine.high %v3159_v7, %v3159_v7  ;;  %v3183_v13 = vcombine.high %v3177_v12, %v3177_v12  ;;  %v3189_v15 = vld [vmem:[%s3148_s22 + $0x18] sm:$0xff]  ;;  %v3214_v21 = vld [vmem:[%s3148_s22 + $0x20] sm:$0xff]  ;;  %v218_v34 = vshrl.u32 %v217_v32, 7 }
  0x13   : > { %v3205_v19 = vcombine.high %v3189_v15, %v3189_v15  ;;  %v3225_v24 = vcombine.high %v3214_v21, %v3214_v21  ;;  %s197_s14 = scalar_lea.vmem %s4767_s4, %s2944_s11 }
  0x14   : > { %v3264_v35 = vsub.s32 0, %v218_v34  ;;  %v3266_v36 = vsub.s32 4, %v218_v34  ;;  %v3269_v37 = vsub.s32 1, %v218_v34  ;;  %v3271_v38 = vsub.s32 5, %v218_v34 }
  0x15   : > { %v3273_v39 = vsub.s32 2, %v218_v34  ;;  %v3275_v40 = vsub.s32 6, %v218_v34  ;;  %v3277_v41 = vsub.s32 3, %v218_v34  ;;  %v3279_v42 = vsub.s32 7, %v218_v34 }
  0x16   : > { %3001 = vset.pattern.permute.xlu1 %v3060_v6  ;;  %635 = vrot.lane.b32.xlu0 %v3153_v5, %s3061_s23  ;;  %4774 = vst [vmem:[#allocation2_spill] sm:$0xff] %v3266_v36  ;;  %4775 = vst [vmem:[#allocation3_spill] sm:$0xff] %v3271_v38  ;;  %v220_v43 = vrot.slane %v3153_v5, %v3264_v35  ;;  %v224_v44 = vrot.slane %v3153_v5, %v3266_v36  ;;  %v3085_v34 = vmov 24  }
  0x17   : > { %668 = vperm.xlu1 %3001, %v3136_v0   ;;  %3006 = vset.pattern.permute.xlu0 %v3062_v9  ;;  %4776 = vst [vmem:[#allocation4_spill] sm:$0xff] %v3279_v42  ;;  %v323_v46 = vrot.slane %v3153_v5, %v3269_v37  ;;  %v327_v47 = vrot.slane %v3153_v5, %v3271_v38 }
  0x18   : > { %v426_v48 = vrot.slane %v3153_v5, %v3273_v39  ;;  %v430_v49 = vrot.slane %v3153_v5, %v3275_v40  ;;  %v529_v50 = vrot.slane %v3153_v5, %v3277_v41  ;;  %v533_v51 = vrot.slane %v3153_v5, %v3279_v42 }
  0x19   : > { %v3303_v52 = vrot.slane %v220_v43, %v3264_v35  ;;  %v228_v53 = vrot.slane %v3159_v7, %v3264_v35  ;;  %v331_v54 = vrot.slane %v3159_v7, %v3269_v37  ;;  %v434_v55 = vrot.slane %v3159_v7, %v3273_v39 }
  0x1a   : > { %639 = vrot.lane.b32.xlu0 %v3159_v7, %s3061_s23  ;;  %v3312_v56 = vrot.slane %v224_v44, %v3264_v35  ;;  %v537_v57 = vrot.slane %v3159_v7, %v3277_v41  ;;  %v232_v58 = vrot.slane %v3159_v7, %v3266_v36  ;;  %v335_v59 = vrot.slane %v3159_v7, %v3271_v38 }
  0x1b   : > { %637 = vrot.lane.b32.xlu1 %v3163_v8, %s3061_s23  ;;  %v3321_v60 = vrot.slane %v323_v46, %v3269_v37  ;;  %v3324_v61 = vrot.slane %v327_v47, %v3269_v37  ;;  %v3327_v62 = vrot.slane %v426_v48, %v3273_v39  ;;  %v438_v63 = vrot.slane %v3159_v7, %v3275_v40 }
  0x1c   : > { %3002 = vset.pattern.permute.xlu1 %v3063_v11  ;;  %v3332_v3 = vrot.slane %v430_v49, %v3273_v39  ;;  %v3335_v6 = vrot.slane %v529_v50, %v3277_v41  ;;  %v3338_v9 = vrot.slane %v533_v51, %v3277_v41  ;;  %v541_v11 = vrot.slane %v3159_v7, %v3279_v42 }
  0x1d   : > { %v3378_v43 = vand.u32 127, %v217_v32  ;;  %v549_v44 = vrot.slane %v3177_v12, %v3279_v42  ;;  %v347_v46 = vrot.slane %v3189_v15, %v3269_v37  ;;  %v248_v47 = vrot.slane %v3189_v15, %v3266_v36 }
  0x1e   : > { %641 = vrot.lane.b32.xlu0 %v3169_v10, %s3061_s23  ;;  %v351_v48 = vrot.slane %v3189_v15, %v3271_v38  ;;  %v252_v32 = vrot.slane %v3214_v21, %v3264_v35  ;;  %v355_v49 = vrot.slane %v3214_v21, %v3269_v37 }
  0x1f   : > { %726 = vperm.xlu1 %3002, %v3136_v0   ;;  %vm657_vm0 = vcmp.lt.s32.totalorder %v3378_v43, 127  ;;  %vm919_vm1 = vcmp.lt.s32.totalorder %v3378_v43, 126  ;;  %vm1181_vm2 = vcmp.lt.s32.totalorder %v3378_v43, 92  ;;  %vm1443_vm3 = vcmp.lt.s32.totalorder %v3378_v43, 91 }
  0x20   : > { %vm1705_vm4 = vcmp.lt.s32.totalorder %v3378_v43, 90  ;;  %vm1967_vm5 = vcmp.lt.s32.totalorder %v3378_v43, 56  ;;  %vm2229_vm6 = vcmp.lt.s32.totalorder %v3378_v43, 55  ;;  %vm2491_vm7 = vcmp.lt.s32.totalorder %v3378_v43, 54 }
  0x22   : > { %643 = vrot.lane.b32.xlu0 %v3177_v12, %s3061_s23 }
  0x23   : > { %3003 = vset.pattern.permute.xlu1 %v3064_v14  ;;  %v273_v14 = vrot.slane %v228_v53, %v3264_v35 }
  0x24   : > { %784 = vperm.xlu1 %3003, %v3136_v0  }
  0x26   : > { %645 = vrot.lane.b32.xlu0 %v3183_v13, %s3061_s23 }
  0x28   : > { %3004 = vset.pattern.permute.xlu1 %v3065_v16  ;;  %v376_v16 = vrot.slane %v331_v54, %v3269_v37 }
  0x29   : > { %842 = vperm.xlu1 %3004, %v3136_v0  }
  0x2a   : > { %647 = vrot.lane.b32.xlu0 %v3189_v15, %s3061_s23 }
  0x2d   : > { %3005 = vset.pattern.permute.xlu1 %v3066_v17  ;;  %v3348_v17 = vrot.slane %v434_v55, %v3273_v39 }
  0x2e   : > { %901 = vrot.lane.b32.xlu0 %v3163_v8, %s3067_s24  ;;  %930 = vperm.xlu1 %3005, %v3136_v0  }
  0x32   : > { %988 = vperm.xlu0 %3006, %v3136_v0   ;;  %899 = vrot.lane.b32.xlu1 %v3153_v5, %s3067_s24 }
  0x33   : > { %3034 = vset.pattern.permute.xlu1 %v4768_v4 }
  0x36   : > { %3007 = vset.pattern.permute.xlu0 %v3068_v18  ;;  %903 = vrot.lane.b32.xlu1 %v3159_v7, %s3067_s24  ;;  %v3351_v18 = vrot.slane %v537_v57, %v3277_v41 }
  0x37   : > { %1046 = vperm.xlu0 %3007, %v3136_v0  }
  0x3a   : > { %649 = vrot.lane.b32.xlu1 %v3205_v19, %s3061_s23 }
  0x3b   : > { %3008 = vset.pattern.permute.xlu0 %v3069_v20  ;;  %v277_v20 = vrot.slane %v232_v58, %v3264_v35 }
  0x3c   : > { %1104 = vperm.xlu0 %3008, %v3136_v0  }
  0x3e   : > { %905 = vrot.lane.b32.xlu1 %v3169_v10, %s3067_s24 }
  0x40   : > { %3009 = vset.pattern.permute.xlu0 %v3070_v22  ;;  %v380_v22 = vrot.slane %v335_v59, %v3269_v37 }
  0x41   : > { %1192 = vperm.xlu0 %3009, %v3136_v0  }
  0x42   : > { %651 = vrot.lane.b32.xlu1 %v3214_v21, %s3061_s23 }
  0x45   : > { %1163 = vrot.lane.b32.xlu0 %v3163_v8, %s3071_s25 }
  0x46   : > { %3010 = vset.pattern.permute.xlu0 %v3072_v23  ;;  %907 = vrot.lane.b32.xlu1 %v3177_v12, %s3067_s24  ;;  %v236_v23 = vrot.slane %v3177_v12, %v3264_v35 }
  0x48   : > { %v281_v53 = vrot.slane %v236_v23, %v3264_v35 }
  0x49   : > { %1250 = vperm.xlu0 %3010, %v3136_v0  }
  0x4a   : > { %653 = vrot.lane.b32.xlu1 %v3225_v24, %s3061_s23 }
  0x4d   : > { %3011 = vset.pattern.permute.xlu0 %v3073_v25  ;;  %v3358_v25 = vrot.slane %v438_v63, %v3273_v39 }
  0x4e   : > { %1308 = vperm.xlu0 %3011, %v3136_v0   ;;  %909 = vrot.lane.b32.xlu1 %v3183_v13, %s3067_s24 }
  0x52   : > { %3012 = vset.pattern.permute.xlu0 %v3074_v26  ;;  %911 = vrot.lane.b32.xlu1 %v3189_v15, %s3067_s24  ;;  %v339_v26 = vrot.slane %v3177_v12, %v3269_v37 }
  0x53   : > { %1366 = vperm.xlu0 %3012, %v3136_v0  }
  0x54   : > { %v384_v54 = vrot.slane %v339_v26, %v3269_v37  ;;  %v392_v26 = vrot.slane %v347_v46, %v3269_v37 }
  0x56   : > { %1161 = vrot.lane.b32.xlu1 %v3153_v5, %s3071_s25 }
  0x57   : > { %3013 = vset.pattern.permute.xlu0 %v3075_v27  ;;  %v442_v27 = vrot.slane %v3177_v12, %v3273_v39 }
  0x58   : > { %1454 = vperm.xlu0 %3013, %v3136_v0  }
  0x59   : > { %v487_v55 = vrot.slane %v442_v27, %v3273_v39  ;;  %v293_v27 = vrot.slane %v248_v47, %v3264_v35 }
  0x5a   : > { %1165 = vrot.lane.b32.xlu1 %v3159_v7, %s3071_s25 }
  0x5c   : > { %1425 = vrot.lane.b32.xlu0 %v3163_v8, %s3076_s26 }
  0x5d   : > { %3014 = vset.pattern.permute.xlu0 %v3077_v28  ;;  %v545_v28 = vrot.slane %v3177_v12, %v3277_v41 }
  0x5e   : > { %913 = vrot.lane.b32.xlu1 %v3205_v19, %s3067_s24 }
  0x5f   : > { %v3401_v57 = vrot.slane %v545_v28, %v3277_v41  ;;  %v396_v28 = vrot.slane %v351_v48, %v3269_v37 }
  0x60   : > { %1512 = vperm.xlu0 %3014, %v3136_v0  }
  0x62   : > { %1167 = vrot.lane.b32.xlu1 %v3169_v10, %s3071_s25 }
  0x64   : > { %3015 = vset.pattern.permute.xlu0 %v3078_v29  ;;  %v3367_v29 = vrot.slane %v541_v11, %v3277_v41  ;;  %v3411_v11 = vrot.slane %v549_v44, %v3277_v41  ;;  %v3087_v44 = vmov 25  }
  0x65   : > { %1570 = vperm.xlu0 %3015, %v3136_v0  }
  0x66   : > { %915 = vrot.lane.b32.xlu1 %v3214_v21, %s3067_s24 }
  0x69   : > { %3016 = vset.pattern.permute.xlu0 %v3079_v30  ;;  %v240_v30 = vrot.slane %v3177_v12, %v3266_v36 }
  0x6a   : > { %1169 = vrot.lane.b32.xlu1 %v3177_v12, %s3071_s25  ;;  %1628 = vperm.xlu0 %3016, %v3136_v0  }
  0x6b   : > { %v285_v58 = vrot.slane %v240_v30, %v3264_v35  ;;  %v297_v30 = vrot.slane %v252_v32, %v3264_v35 }
  0x6e   : > { %917 = vrot.lane.b32.xlu1 %v3225_v24, %s3067_s24  ;;  %3017 = vset.pattern.permute.xlu0 %v3080_v31  ;;  %v343_v31 = vrot.slane %v3177_v12, %v3271_v38 }
  0x6f   : > { %1716 = vperm.xlu0 %3017, %v3136_v0  }
  0x70   : > { %v388_v59 = vrot.slane %v343_v31, %v3269_v37  ;;  %v3421_v31 = vrot.slane %v355_v49, %v3269_v37 }
  0x72   : > { %1171 = vrot.lane.b32.xlu1 %v3183_v13, %s3071_s25 }
  0x73   : > { %1687 = vrot.lane.b32.xlu0 %v3163_v8, %s3081_s27 }
  0x74   : > { %3018 = vset.pattern.permute.xlu0 %v3082_v33  ;;  %v446_v33 = vrot.slane %v3177_v12, %v3275_v40 }
  0x76   : > { %1173 = vrot.lane.b32.xlu1 %v3189_v15, %s3071_s25 }
  0x77   : > { %1774 = vperm.xlu0 %3018, %v3136_v0  }
  0x7a   : > { %1423 = vrot.lane.b32.xlu1 %v3153_v5, %s3076_s26 }
  0x7b   : > { %3019 = vset.pattern.permute.xlu0 %v3083_v45  ;;  %v244_v45 = vrot.slane %v3189_v15, %v3264_v35 }
  0x7c   : > { %1832 = vperm.xlu0 %3019, %v3136_v0  }
  0x7d   : > { %v289_v23 = vrot.slane %v244_v45, %v3264_v35 }
  0x7e   : > { %1427 = vrot.lane.b32.xlu1 %v3159_v7, %s3076_s26 }
  0x80   : > { %3020 = vset.pattern.permute.xlu0 %v3084_v1  ;;  %v491_v1 = vrot.slane %v446_v33, %v3273_v39 }
  0x81   : > { %1890 = vperm.xlu0 %3020, %v3136_v0  }
  0x82   : > { %1175 = vrot.lane.b32.xlu1 %v3205_v19, %s3071_s25 }
  0x85   : > { %3021 = vset.pattern.permute.xlu0 %v3085_v34 }
  0x86   : > { %1429 = vrot.lane.b32.xlu1 %v3169_v10, %s3076_s26  ;;  %1978 = vperm.xlu0 %3021, %v3136_v0  }
  0x88   : > { %v3395_v50 = vpop.permute.xlu1 %420  ;;  %v210_v51 = vpop.permute.xlu0 %209 }
  0x89   : > { %v298_v33 = vmul.f32 %v3303_v52, %v210_v51  ;;  %v299_v34 = vmul.f32 %v3312_v56, %v210_v51  ;;  %v300_v47 = vmul.f32 %v273_v14, %v210_v51  ;;  %v301_v4 = vmul.f32 %v277_v20, %v210_v51 }
  0x8a   : > { %1177 = vrot.lane.b32.xlu1 %v3214_v21, %s3071_s25  ;;  %1949 = vrot.lane.b32.xlu0 %v3163_v8, %s3086_s28  ;;  %v302_v52 = vmul.f32 %v281_v53, %v210_v51  ;;  %v504_v56 = vmul.f32 %v3327_v62, %v3395_v50  ;;  %v303_v2 = vmul.f32 %v285_v58, %v210_v51 }
  0x8b   : > { %3022 = vset.pattern.permute.xlu0 %v3087_v44  ;;  %v304_v63 = vmul.f32 %v289_v23, %v210_v51  ;;  %v505_v38 = vmul.f32 %v3332_v3, %v3395_v50  ;;  %v508_v3 = vmul.f32 %v487_v55, %v3395_v50 }
  0x8d   : > { %v3426_v45 = vpop.permute.xlu1 %523  ;;  %v3428_v46 = vpop.permute.xlu0 %317 }
  0x8e   : > { %v401_v48 = vmul.f32 %v3321_v60, %v3428_v46  ;;  %v402_v32 = vmul.f32 %v3324_v61, %v3428_v46  ;;  %1431 = vrot.lane.b32.xlu1 %v3177_v12, %s3076_s26  ;;  %v403_v49 = vmul.f32 %v376_v16, %v3428_v46  ;;  %v404_v44 = vmul.f32 %v380_v22, %v3428_v46 }
  0x8f   : > { %2036 = vperm.xlu0 %3022, %v3136_v0   ;;  %v405_v60 = vmul.f32 %v384_v54, %v3428_v46  ;;  %v406_v62 = vmul.f32 %v388_v59, %v3428_v46  ;;  %v506_v16 = vmul.f32 %v3348_v17, %v3395_v50  ;;  %v507_v22 = vmul.f32 %v3358_v25, %v3395_v50 }
  0x90   : > { %v410_v14 = vadd.f32 %v401_v48, %v298_v33  ;;  %v411_v20 = vadd.f32 %v402_v32, %v299_v34  ;;  %v412_v53 = vadd.f32 %v403_v49, %v300_v47  ;;  %v413_v36 = vadd.f32 %v404_v44, %v301_v4 }
  0x91   : > { %v636_v61 = vpop.permute.xlu0 %635  ;;  %v414_v54 = vadd.f32 %v405_v60, %v302_v52  ;;  %v407_v58 = vmul.f32 %v392_v26, %v3428_v46  ;;  %v415_v23 = vadd.f32 %v406_v62, %v303_v2  ;;  %v509_v4 = vmul.f32 %v491_v1, %v3395_v50 }
  0x92   : > { %v3445_v42 = vpop.permute.xlu1 %668  ;;  %1179 = vrot.lane.b32.xlu1 %v3225_v24, %s3071_s25  ;;  %v305_v59 = vmul.f32 %v293_v27, %v210_v51  ;;  %v3088_v33 = vmov 26   ;;  %v607_v17 = vmul.f32 %v3335_v6, %v3426_v45  ;;  %v608_v34 = vmul.f32 %v3338_v9, %v3426_v45 }
  0x93   : > { %3023 = vset.pattern.permute.xlu0 %v3088_v33  ;;  %v3460_v47 = vadd.f32 %v407_v58, %v304_v63  ;;  %v306_v25 = vmul.f32 %v297_v30, %v210_v51  ;;  %v513_v48 = vadd.f32 %v504_v56, %v410_v14  ;;  %v514_v55 = vadd.f32 %v505_v38, %v411_v20 }
  0x94   : > { %2094 = vperm.xlu0 %3023, %v3136_v0   ;;  %v609_v2 = vmul.f32 %v3351_v18, %v3426_v45  ;;  %v408_v1 = vmul.f32 %v396_v28, %v3428_v46  ;;  %v515_v32 = vadd.f32 %v506_v16, %v412_v53  ;;  %v610_v6 = vmul.f32 %v3367_v29, %v3426_v45 }
  0x95   : > { %v640_v26 = vpop.permute.xlu0 %639  ;;  %v611_v9 = vmul.f32 %v3401_v57, %v3426_v45  ;;  %v612_v51 = vmul.f32 %v3411_v11, %v3426_v45  ;;  %v516_v63 = vadd.f32 %v507_v22, %v413_v36  ;;  %v3089_v52 = vmov 27  }
  0x96   : > { %v638_v27 = vpop.permute.xlu1 %637  ;;  %1433 = vrot.lane.b32.xlu1 %v3183_v13, %s3076_s26  ;;  %v3482_v28 = vadd.f32 %v408_v1, %v305_v59  ;;  %v616_v56 = vadd.f32 %v607_v17, %v513_v48  ;;  %v617_v49 = vadd.f32 %v608_v34, %v514_v55  ;;  %v517_v36 = vadd.f32 %v508_v3, %v414_v54 }
  0x97   : > { %v3476_v38 = vsel %vm657_vm0, %v638_v27, %v640_v26  ;;  %v3480_v18 = vsel %vm657_vm0, %v636_v61, %v638_v27  ;;  %v409_v14 = vmul.f32 %v3421_v31, %v3428_v46  ;;  %v618_v61 = vadd.f32 %v609_v2, %v515_v32 }
  0x98   : > { %v674_v29 = vrot.slane %v3480_v18, %v3264_v35  ;;  %v678_v57 = vrot.slane %v3476_v38, %v3264_v35  ;;  %v732_v11 = vrot.slane %v3480_v18, %v3269_v37  ;;  %v736_v30 = vrot.slane %v3476_v38, %v3269_v37  ;;  %3024 = vset.pattern.permute.xlu0 %v3089_v52 }
  0x99   : > { %v642_v44 = vpop.permute.xlu0 %641  ;;  %2152 = vperm.xlu0 %3024, %v3136_v0   ;;  %v619_v22 = vadd.f32 %v610_v6, %v516_v63  ;;  %v790_v33 = vrot.slane %v3480_v18, %v3273_v39  ;;  %v3516_v48 = vadd.f32 %v409_v14, %v306_v25  ;;  %v3090_v55 = vmov 28  }
  0x9a   : > { %v707_v20 = vmul.f32 %v674_v29, %v3445_v42  ;;  %v708_v60 = vmul.f32 %v678_v57, %v3445_v42  ;;  %v3499_v53 = vsel %vm657_vm0, %v640_v26, %v642_v44  ;;  %v3501_v62 = vpop.permute.xlu1 %726  ;;  %1435 = vrot.lane.b32.xlu1 %v3189_v15, %s3076_s26  ;;  %v518_v26 = vadd.f32 %v509_v4, %v415_v23 }
  0x9b   : > { %v682_v16 = vrot.slane %v3499_v53, %v3264_v35  ;;  %v740_v31 = vrot.slane %v3499_v53, %v3269_v37  ;;  %v798_v46 = vrot.slane %v3499_v53, %v3273_v39  ;;  %v765_v3 = vmul.f32 %v732_v11, %v3501_v62 }
  0x9c   : > { %v716_v54 = vadd.f32 %v707_v20, %v616_v56  ;;  %v717_v58 = vadd.f32 %v708_v60, %v617_v49  ;;  %v766_v59 = vmul.f32 %v736_v30, %v3501_v62  ;;  %v794_v2 = vrot.slane %v3476_v38, %v3273_v39 }
  0x9d   : > { %v709_v17 = vmul.f32 %v682_v16, %v3445_v42  ;;  %v644_v34 = vpop.permute.xlu0 %643  ;;  %3025 = vset.pattern.permute.xlu0 %v3090_v55  ;;  %v767_v63 = vmul.f32 %v740_v31, %v3501_v62  ;;  %v620_v29 = vadd.f32 %v611_v9, %v517_v36  ;;  %v848_v52 = vrot.slane %v3480_v18, %v3277_v41 }
  0x9e   : > { %v3522_v1 = vsel %vm657_vm0, %v642_v44, %v644_v34  ;;  %1685 = vrot.lane.b32.xlu1 %v3153_v5, %s3081_s27  ;;  %v774_v27 = vadd.f32 %v765_v3, %v716_v54  ;;  %v775_v32 = vadd.f32 %v766_v59, %v717_v58  ;;  %2240 = vperm.xlu0 %3025, %v3136_v0   ;;  %v3092_v58 = vmov 29  }
  0x9f   : > { %v718_v6 = vadd.f32 %v709_v17, %v618_v61  ;;  %v686_v23 = vrot.slane %v3522_v1, %v3264_v35  ;;  %v744_v4 = vrot.slane %v3522_v1, %v3269_v37  ;;  %v3530_v25 = vpop.permute.xlu1 %784  ;;  %v621_v44 = vadd.f32 %v612_v51, %v518_v26 }
  0xa0   : > { %v823_v57 = vmul.f32 %v790_v33, %v3530_v25  ;;  %v824_v11 = vmul.f32 %v794_v2, %v3530_v25  ;;  %v825_v30 = vmul.f32 %v798_v46, %v3530_v25  ;;  %v856_v20 = vrot.slane %v3499_v53, %v3277_v41 }
  0xa1   : > { %v710_v56 = vmul.f32 %v686_v23, %v3445_v42  ;;  %v646_v49 = vpop.permute.xlu0 %645  ;;  %v776_v14 = vadd.f32 %v767_v63, %v718_v6  ;;  %v768_v16 = vmul.f32 %v744_v4, %v3501_v62  ;;  %v852_v51 = vrot.slane %v3476_v38, %v3277_v41 }
  0xa2   : > { %v662_v9 = vsel %vm657_vm0, %v644_v34, %v646_v49  ;;  %1689 = vrot.lane.b32.xlu1 %v3159_v7, %s3081_s27  ;;  %v832_v36 = vadd.f32 %v823_v57, %v774_v27  ;;  %v833_v60 = vadd.f32 %v824_v11, %v775_v32  ;;  %2211 = vrot.lane.b32.xlu0 %v3163_v8, %s3091_s29 }
  0xa3   : > { %v719_v61 = vadd.f32 %v710_v56, %v619_v22  ;;  %v690_v18 = vrot.slane %v662_v9, %v3264_v35  ;;  %v748_v31 = vrot.slane %v662_v9, %v3269_v37  ;;  %v802_v53 = vrot.slane %v3522_v1, %v3273_v39  ;;  %3026 = vset.pattern.permute.xlu0 %v3092_v58 }
  0xa4   : > { %v860_v46 = vrot.slane %v3522_v1, %v3277_v41  ;;  %v3557_v22 = vpop.permute.xlu1 %842  ;;  %v834_v54 = vadd.f32 %v825_v30, %v776_v14  ;;  %v806_v33 = vrot.slane %v662_v9, %v3273_v39  ;;  %v864_v17 = vrot.slane %v662_v9, %v3277_v41 }
  0xa5   : > { %v777_v3 = vadd.f32 %v768_v16, %v719_v61  ;;  %v711_v59 = vmul.f32 %v690_v18, %v3445_v42  ;;  %v3562_v34 = vpop.permute.xlu0 %647  ;;  %v881_v26 = vmul.f32 %v848_v52, %v3557_v22  ;;  %v882_v55 = vmul.f32 %v852_v51, %v3557_v22 }
  0xa6   : > { %v661_v38 = vsel %vm657_vm0, %v646_v49, %v3562_v34  ;;  %1437 = vrot.lane.b32.xlu1 %v3205_v19, %s3076_s26  ;;  %v883_v2 = vmul.f32 %v856_v20, %v3557_v22  ;;  %v769_v27 = vmul.f32 %v748_v31, %v3501_v62  ;;  %2298 = vperm.xlu0 %3026, %v3136_v0   ;;  %v3093_v18 = vmov 30  }
  0xa7   : > { %v720_v1 = vadd.f32 %v711_v59, %v620_v29  ;;  %v694_v32 = vrot.slane %v661_v38, %v3264_v35  ;;  %v752_v6 = vrot.slane %v661_v38, %v3269_v37  ;;  %v890_v23 = vadd.f32 %v881_v26, %v832_v36 }
  0xa8   : > { %v3576_v4 = vadd.f32 %v882_v55, %v833_v60  ;;  %v3578_v63 = vadd.f32 %v883_v2, %v834_v54  ;;  %v826_v57 = vmul.f32 %v802_v53, %v3530_v25  ;;  %v827_v30 = vmul.f32 %v806_v33, %v3530_v25 }
  0xa9   : > { %v778_v11 = vadd.f32 %v769_v27, %v720_v1  ;;  %v712_v29 = vmul.f32 %v694_v32, %v3445_v42  ;;  %v810_v52 = vrot.slane %v661_v38, %v3273_v39  ;;  %v3584_v56 = vpop.permute.xlu1 %930  ;;  %v902_v49 = vpop.permute.xlu0 %901  ;;  %v868_v14 = vrot.slane %v661_v38, %v3277_v41 }
  0xaa   : > { %1691 = vrot.lane.b32.xlu1 %v3169_v10, %s3081_s27  ;;  %v835_v20 = vadd.f32 %v826_v57, %v777_v3  ;;  %v884_v9 = vmul.f32 %v860_v46, %v3557_v22  ;;  %v770_v61 = vmul.f32 %v752_v6, %v3501_v62  ;;  %v885_v16 = vmul.f32 %v864_v17, %v3557_v22 }
  0xab   : > { %v836_v36 = vadd.f32 %v827_v30, %v778_v11  ;;  %v721_v60 = vadd.f32 %v712_v29, %v621_v44  ;;  %3027 = vset.pattern.permute.xlu0 %v3093_v18  ;;  %v553_v31 = vrot.slane %v3189_v15, %v3277_v41  ;;  %v828_v54 = vmul.f32 %v810_v52, %v3530_v25 }
  0xac   : > { %v3595_v51 = vadd.f32 %v884_v9, %v835_v20  ;;  %2356 = vperm.xlu0 %3027, %v3136_v0   ;;  %v4777_v59 = vrot.slane %v3189_v15, %v3273_v39  ;;  %v886_v38 = vmul.f32 %v868_v14, %v3557_v22  ;;  %v3094_v2 = vmov 31  }
  0xad   : > { %v779_v53 = vadd.f32 %v770_v61, %v721_v60  ;;  %v900_v58 = vpop.permute.xlu1 %899  ;;  %v3599_v46 = vpop.permute.xlu0 %988  ;;  %v3601_v44 = vadd.f32 %v885_v16, %v836_v36  ;;  %v598_v6 = vrot.slane %v553_v31, %v3277_v41 }
  0xae   : > { %v928_v3 = vsel %vm919_vm1, %v900_v58, %v902_v49  ;;  %v495_v33 = vrot.slane %v4777_v59, %v3273_v39  ;;  %1439 = vrot.lane.b32.xlu1 %v3214_v21, %s3076_s26 }
  0xaf   : > { %v837_v17 = vadd.f32 %v828_v54, %v779_v53  ;;  %v936_v26 = vrot.slane %v928_v3, %v3264_v35  ;;  %v994_v55 = vrot.slane %v928_v3, %v3269_v37  ;;  %v1052_v11 = vrot.slane %v928_v3, %v3273_v39 }
  0xb0   : > { %3028 = vset.pattern.permute.xlu0 %v3094_v2  ;;  %v510_v52 = vmul.f32 %v495_v33, %v3395_v50  ;;  %v1110_v53 = vrot.slane %v928_v3, %v3277_v41  ;;  %v613_v59 = vmul.f32 %v598_v6, %v3426_v45 }
  0xb1   : > { %v3614_v1 = vadd.f32 %v886_v38, %v837_v17  ;;  %v969_v27 = vmul.f32 %v936_v26, %v3584_v56  ;;  %v904_v32 = vpop.permute.xlu1 %903  ;;  %v1027_v57 = vmul.f32 %v994_v55, %v3599_v46  ;;  %2414 = vperm.xlu0 %3028, %v3136_v0  }
  0xb2   : > { %v927_v30 = vsel %vm919_vm1, %v902_v49, %v904_v32  ;;  %v3623_v29 = vpop.permute.xlu0 %1046  ;;  %1693 = vrot.lane.b32.xlu1 %v3177_v12, %s3081_s27  ;;  %v519_v60 = vadd.f32 %v510_v52, %v3460_v47 }
  0xb3   : > { %v978_v14 = vadd.f32 %v969_v27, %v890_v23  ;;  %v940_v20 = vrot.slane %v927_v30, %v3264_v35  ;;  %v998_v9 = vrot.slane %v927_v30, %v3269_v37  ;;  %v1056_v36 = vrot.slane %v927_v30, %v3273_v39 }
  0xb4   : > { %v1085_v61 = vmul.f32 %v1052_v11, %v3623_v29  ;;  %v3095_v23 = vmov 32   ;;  %v1114_v54 = vrot.slane %v927_v30, %v3277_v41  ;;  %v622_v2 = vadd.f32 %v613_v59, %v519_v60 }
  0xb5   : > { %v970_v49 = vmul.f32 %v940_v20, %v3584_v56  ;;  %v1028_v16 = vmul.f32 %v998_v9, %v3599_v46  ;;  %v3635_v18 = vpop.permute.xlu1 %649  ;;  %v1036_v31 = vadd.f32 %v1027_v57, %v978_v14  ;;  %v1086_v12 = vmul.f32 %v1056_v36, %v3623_v29  ;;  %3029 = vset.pattern.permute.xlu0 %v3095_v23 }
  0xb6   : > { %v660_v47 = vsel %vm657_vm0, %v3562_v34, %v3635_v18  ;;  %1441 = vrot.lane.b32.xlu1 %v3225_v24, %s3076_s26  ;;  %2502 = vperm.xlu0 %3029, %v3136_v0   ;;  %v3097_v36 = vmov 33   ;;  %v454_v59 = vrot.slane %v3189_v15, %v3275_v40 }
  0xb7   : > { %v979_v58 = vadd.f32 %v970_v49, %v3576_v4  ;;  %v698_v33 = vrot.slane %v660_v47, %v3264_v35  ;;  %v756_v3 = vrot.slane %v660_v47, %v3269_v37  ;;  %v3651_v17 = vpop.permute.xlu0 %1104  ;;  %v1094_v26 = vadd.f32 %v1085_v61, %v1036_v31 }
  0xb8   : > { %v1143_v38 = vmul.f32 %v1110_v53, %v3651_v17  ;;  %v1144_v34 = vmul.f32 %v1114_v54, %v3651_v17  ;;  %v814_v57 = vrot.slane %v660_v47, %v3273_v39  ;;  %v872_v6 = vrot.slane %v660_v47, %v3277_v41 }
  0xb9   : > { %v1037_v55 = vadd.f32 %v1028_v16, %v979_v58  ;;  %v713_v27 = vmul.f32 %v698_v33, %v3445_v42  ;;  %v906_v4 = vpop.permute.xlu1 %905  ;;  %v771_v14 = vmul.f32 %v756_v3, %v3501_v62  ;;  %v458_v33 = vrot.slane %v3214_v21, %v3273_v39 }
  0xba   : > { %v926_v11 = vsel %vm919_vm1, %v904_v32, %v906_v4  ;;  %1695 = vrot.lane.b32.xlu1 %v3183_v13, %s3081_s27  ;;  %v3662_v30 = vadd.f32 %v1143_v38, %v1094_v26  ;;  %2473 = vrot.lane.b32.xlu0 %v3163_v8, %s3096_s30  ;;  %v829_v49 = vmul.f32 %v814_v57, %v3530_v25  ;;  %v3098_v57 = vmov 34  }
  0xbb   : > { %v722_v52 = vadd.f32 %v713_v27, %v622_v2  ;;  %v944_v20 = vrot.slane %v926_v11, %v3264_v35  ;;  %v1002_v9 = vrot.slane %v926_v11, %v3269_v37  ;;  %3030 = vset.pattern.permute.xlu0 %v3097_v36  ;;  %v1095_v32 = vadd.f32 %v1086_v12, %v1037_v55  ;;  %v4778_v2 = vld [vmem:[#allocation4_spill] sm:$0xff] }
  0xbc   : > { %v3669_v60 = vpop.permute.xlu0 %1192  ;;  %v1060_v31 = vrot.slane %v926_v11, %v3273_v39  ;;  %v887_v23 = vmul.f32 %v872_v6, %v3557_v22  ;;  %v1118_v58 = vrot.slane %v926_v11, %v3277_v41 }
  0xbd   : > { %v780_v61 = vadd.f32 %v771_v14, %v722_v52  ;;  %v971_v16 = vmul.f32 %v944_v20, %v3584_v56  ;;  %v3674_v8 = vpop.permute.xlu1 %651  ;;  %v3679_v53 = vadd.f32 %v1144_v34, %v1095_v32  ;;  %v1029_v47 = vmul.f32 %v1002_v9, %v3599_v46 }
  0xbe   : > { %1697 = vrot.lane.b32.xlu1 %v3189_v15, %s3081_s27  ;;  %2560 = vperm.xlu0 %3030, %v3136_v0   ;;  %v1087_v26 = vmul.f32 %v1060_v31, %v3623_v29  ;;  %v1145_v11 = vmul.f32 %v1118_v58, %v3651_v17  ;;  %v499_v20 = vrot.slane %v454_v59, %v3273_v39 }
  0xbf   : > { %v838_v54 = vadd.f32 %v829_v49, %v780_v61  ;;  %v980_v12 = vadd.f32 %v971_v16, %v3578_v63  ;;  %v557_v63 = vrot.slane %v3189_v15, %v4778_v2  ;;  %v503_v9 = vrot.slane %v458_v33, %v3273_v39 }
  0xc0   : > { %v3692_v55 = vpop.permute.xlu0 %1163 }
  0xc1   : > { %v3689_v3 = vadd.f32 %v887_v23, %v838_v54  ;;  %v1038_v38 = vadd.f32 %v1029_v47, %v980_v12  ;;  %v908_v34 = vpop.permute.xlu1 %907  ;;  %v3099_v54 = vmov 35   ;;  %v511_v12 = vmul.f32 %v499_v20, %v3395_v50 }
  0xc2   : > { %v925_v27 = vsel %vm919_vm1, %v906_v4, %v908_v34  ;;  %1947 = vrot.lane.b32.xlu1 %v3153_v5, %s3086_s28  ;;  %3031 = vset.pattern.permute.xlu0 %v3098_v57  ;;  %v561_v4 = vrot.slane %v3214_v21, %v3277_v41  ;;  %v602_v47 = vrot.slane %v557_v63, %v3277_v41 }
  0xc3   : > { %v1096_v6 = vadd.f32 %v1087_v26, %v1038_v38  ;;  %v948_v52 = vrot.slane %v925_v27, %v3264_v35  ;;  %v1006_v14 = vrot.slane %v925_v27, %v3269_v37  ;;  %2618 = vperm.xlu0 %3031, %v3136_v0   ;;  %v1064_v32 = vrot.slane %v925_v27, %v3273_v39 }
  0xc4   : > { %v1122_v31 = vrot.slane %v925_v27, %v3277_v41  ;;  %v3719_v23 = vpop.permute.xlu0 %1250  ;;  %v512_v58 = vmul.f32 %v503_v9, %v3395_v50  ;;  %v606_v59 = vrot.slane %v561_v4, %v3277_v41  ;;  %v520_v26 = vadd.f32 %v511_v12, %v3482_v28 }
  0xc5   : > { %v3708_v36 = vadd.f32 %v1145_v11, %v1096_v6  ;;  %v972_v5 = vmul.f32 %v948_v52, %v3584_v56  ;;  %v3712_v61 = vpop.permute.xlu1 %653  ;;  %v1030_v16 = vmul.f32 %v1006_v14, %v3599_v46  ;;  %v1088_v33 = vmul.f32 %v1064_v32, %v3623_v29 }
  0xc6   : > { %1951 = vrot.lane.b32.xlu1 %v3159_v7, %s3086_s28  ;;  %v3730_v7 = vsel %vm657_vm0, %v3635_v18, %v3674_v8  ;;  %v521_v63 = vadd.f32 %v512_v58, %v3516_v48  ;;  %v1146_v18 = vmul.f32 %v1122_v31, %v3651_v17  ;;  %v614_v6 = vmul.f32 %v602_v47, %v3426_v45 }
  0xc7   : > { %v981_v49 = vadd.f32 %v972_v5, %v3595_v51  ;;  %3032 = vset.pattern.permute.xlu0 %v3099_v54  ;;  %v702_v28 = vrot.slane %v3730_v7, %v3264_v35  ;;  %v760_v48 = vrot.slane %v3730_v7, %v3269_v37  ;;  %v818_v11 = vrot.slane %v3730_v7, %v3273_v39 }
  0xc8   : > { %2676 = vperm.xlu0 %3032, %v3136_v0   ;;  %v4779_v5 = vmov 0   ;;  %v623_v32 = vadd.f32 %v614_v6, %v520_v26 }
  0xc9   : > { %v1039_v51 = vadd.f32 %v1030_v16, %v981_v49  ;;  %v910_v38 = vpop.permute.xlu1 %909  ;;  %v3759_v4 = vpop.permute.xlu0 %1308  ;;  %v714_v47 = vmul.f32 %v702_v28, %v3445_v42  ;;  %v772_v58 = vmul.f32 %v760_v48, %v3501_v62 }
  0xca   : > { %v924_v50 = vsel %vm919_vm1, %v908_v34, %v910_v38  ;;  %1699 = vrot.lane.b32.xlu1 %v3205_v19, %s3081_s27  ;;  %v615_v34 = vmul.f32 %v606_v59, %v3426_v45  ;;  %v876_v59 = vrot.slane %v3730_v7, %v3277_v41 }
  0xcb   : > { %v1097_v0 = vadd.f32 %v1088_v33, %v1039_v51  ;;  %v952_v27 = vrot.slane %v924_v50, %v3264_v35  ;;  %v1010_v57 = vrot.slane %v924_v50, %v3269_v37  ;;  %v1068_v20 = vrot.slane %v924_v50, %v3273_v39 }
  0xcc   : > { %2483 = vrot.lane.b32.xlu0 %v3189_v15, %s3096_s30  ;;  %v3762_v45 = vadd.f32 %v615_v34, %v521_v63  ;;  %v1126_v15 = vrot.slane %v924_v50, %v3277_v41  ;;  %v723_v34 = vadd.f32 %v714_v47, %v623_v32 }
  0xcd   : > { %v3753_v52 = vadd.f32 %v1146_v18, %v1097_v0  ;;  %v973_v14 = vmul.f32 %v952_v27, %v3584_v56  ;;  %v3757_v9 = vpop.permute.xlu1 %911  ;;  %3033 = vset.pattern.permute.xlu0 %v4779_v5  ;;  %v1031_v31 = vmul.f32 %v1010_v57, %v3599_v46 }
  0xce   : > { %v923_v49 = vsel %vm919_vm1, %v910_v38, %v3757_v9  ;;  %1953 = vrot.lane.b32.xlu1 %v3169_v10, %s3086_s28  ;;  %v1089_v38 = vmul.f32 %v1068_v20, %v3623_v29  ;;  %v1147_v50 = vmul.f32 %v1126_v15, %v3651_v17  ;;  %v3795_v48 = vpop.permute.xlu0 %1366 }
  0xcf   : > { %v982_v16 = vadd.f32 %v973_v14, %v3601_v44  ;;  %v956_v54 = vrot.slane %v923_v49, %v3264_v35  ;;  %v1014_v12 = vrot.slane %v923_v49, %v3269_v37  ;;  %v1072_v51 = vrot.slane %v923_v49, %v3273_v39 }
  0xd0   : > { %2487 = vrot.lane.b32.xlu0 %v3214_v21, %s3096_s30  ;;  %v830_v44 = vmul.f32 %v818_v11, %v3530_v25  ;;  %v1130_v18 = vrot.slane %v923_v49, %v3277_v41  ;;  %v3801_v11 = vsel %vm657_vm0, %v3674_v8, %v3712_v61  ;;  %v3815_v61 = vld [vmem:[%s3148_s22 + $0x10] sm:$0xff] }
  0xd1   : > { %v1040_v33 = vadd.f32 %v1031_v31, %v982_v16  ;;  %v974_v26 = vmul.f32 %v956_v54, %v3584_v56  ;;  %v1162_v63 = vpop.permute.xlu1 %1161  ;;  %v1032_v0 = vmul.f32 %v1014_v12, %v3599_v46  ;;  %v1090_v14 = vmul.f32 %v1072_v51, %v3623_v29 }
  0xd2   : > { %v1190_v7 = vsel %vm1181_vm2, %v1162_v63, %v3692_v55  ;;  %1701 = vrot.lane.b32.xlu1 %v3214_v21, %s3081_s27  ;;  %v1148_v32 = vmul.f32 %v1130_v18, %v3651_v17 }
  0xd3   : > { %v1098_v27 = vadd.f32 %v1089_v38, %v1040_v33  ;;  %v983_v57 = vadd.f32 %v974_v26, %v3614_v1  ;;  %v1198_v6 = vrot.slane %v1190_v7, %v3264_v35  ;;  %v1256_v28 = vrot.slane %v1190_v7, %v3269_v37 }
  0xd4   : > { %v1372_v21 = vrot.slane %v1190_v7, %v3277_v41  ;;  %v1314_v15 = vrot.slane %v1190_v7, %v3273_v39  ;;  %v781_v33 = vadd.f32 %v772_v58, %v723_v34  ;;  %v706_v38 = vrot.slane %v3801_v11, %v3264_v35 }
  0xd5   : > { %v3805_v20 = vadd.f32 %v1147_v50, %v1098_v27  ;;  %v1041_v1 = vadd.f32 %v1032_v0, %v983_v57  ;;  %v1231_v5 = vmul.f32 %v1198_v6, %v3669_v60  ;;  %v1166_v49 = vpop.permute.xlu1 %1165  ;;  %v1289_v16 = vmul.f32 %v1256_v28, %v3719_v23 }
  0xd6   : > { %v1189_v8 = vsel %vm1181_vm2, %v3692_v55, %v1166_v49  ;;  %1955 = vrot.lane.b32.xlu1 %v3815_v61, %s3086_s28  ;;  %v1405_v31 = vmul.f32 %v1372_v21, %v3795_v48  ;;  %v1347_v0 = vmul.f32 %v1314_v15, %v3759_v4  ;;  %v888_v7 = vmul.f32 %v876_v59, %v3557_v22 }
  0xd7   : > { %v1099_v54 = vadd.f32 %v1090_v14, %v1041_v1  ;;  %v1240_v12 = vadd.f32 %v1231_v5, %v3662_v30  ;;  %v1202_v47 = vrot.slane %v1189_v8, %v3264_v35  ;;  %v1260_v51 = vrot.slane %v1189_v8, %v3269_v37 }
  0xd8   : > { %v1318_v55 = vrot.slane %v1189_v8, %v3273_v39  ;;  %v1376_v26 = vrot.slane %v1189_v8, %v3277_v41  ;;  %v839_v21 = vadd.f32 %v830_v44, %v781_v33  ;;  %v715_v59 = vmul.f32 %v706_v38, %v3445_v42 }
  0xd9   : > { %v3827_v63 = vadd.f32 %v1148_v32, %v1099_v54  ;;  %v1298_v50 = vadd.f32 %v1289_v16, %v1240_v12  ;;  %v1232_v18 = vmul.f32 %v1202_v47, %v3669_v60  ;;  %v914_v30 = vpop.permute.xlu1 %913  ;;  %v1290_v27 = vmul.f32 %v1260_v51, %v3719_v23 }
  0xda   : > { %v1406_v58 = vmul.f32 %v1376_v26, %v3795_v48  ;;  %v922_v57 = vsel %vm919_vm1, %v3757_v9, %v914_v30  ;;  %1703 = vrot.lane.b32.xlu1 %v3225_v24, %s3081_s27  ;;  %v764_v1 = vrot.slane %v3801_v11, %v3269_v37  ;;  %v1348_v5 = vmul.f32 %v1318_v55, %v3759_v4 }
  0xdb   : > { %v1356_v6 = vadd.f32 %v1347_v0, %v1298_v50  ;;  %v1241_v28 = vadd.f32 %v1232_v18, %v3679_v53  ;;  %v960_v34 = vrot.slane %v922_v57, %v3264_v35  ;;  %v1018_v14 = vrot.slane %v922_v57, %v3269_v37 }
  0xdc   : > { %v1076_v32 = vrot.slane %v922_v57, %v3273_v39  ;;  %v822_v53 = vrot.slane %v3801_v11, %v3273_v39  ;;  %v1134_v42 = vrot.slane %v922_v57, %v3277_v41  ;;  %v724_v33 = vadd.f32 %v715_v59, %v3762_v45 }
  0xdd   : > { %v1299_v15 = vadd.f32 %v1290_v27, %v1241_v28  ;;  %v975_v9 = vmul.f32 %v960_v34, %v3584_v56  ;;  %v1168_v16 = vpop.permute.xlu1 %1167  ;;  %v3848_v8 = vadd.f32 %v1405_v31, %v1356_v6  ;;  %v1033_v44 = vmul.f32 %v1018_v14, %v3599_v46  ;;  %v3883_v14 = vpop.permute.xlu0 %1454 }
  0xde   : > { %v1188_v54 = vsel %vm1181_vm2, %v1166_v49, %v1168_v16  ;;  %1957 = vrot.lane.b32.xlu1 %v3183_v13, %s3086_s28  ;;  %v773_v38 = vmul.f32 %v764_v1, %v3501_v62  ;;  %v880_v55 = vrot.slane %v3801_v11, %v3277_v41  ;;  %v1091_v0 = vmul.f32 %v1076_v32, %v3623_v29  ;;  %v3876_v11 = vld [vmem:[%s3148_s22 + $0x18] sm:$0xff] }
  0xdf   : > { %v1357_v12 = vadd.f32 %v1348_v5, %v1299_v15  ;;  %v984_v47 = vadd.f32 %v975_v9, %v3689_v3  ;;  %v1206_v31 = vrot.slane %v1188_v54, %v3264_v35  ;;  %v1264_v51 = vrot.slane %v1188_v54, %v3269_v37 }
  0xe0   : > { %v1322_v49 = vrot.slane %v1188_v54, %v3273_v39  ;;  %v1149_v27 = vmul.f32 %v1134_v42, %v3651_v17  ;;  %v1380_v45 = vrot.slane %v1188_v54, %v3277_v41  ;;  %v897_v59 = vadd.f32 %v888_v7, %v839_v21 }
  0xe1   : > { %v3866_v26 = vadd.f32 %v1406_v58, %v1357_v12  ;;  %v1042_v50 = vadd.f32 %v1033_v44, %v984_v47  ;;  %v1233_v3 = vmul.f32 %v1206_v31, %v3669_v60  ;;  %v916_v18 = vpop.permute.xlu1 %915  ;;  %v1291_v57 = vmul.f32 %v1264_v51, %v3719_v23 }
  0xe2   : > { %v921_v62 = vsel %vm919_vm1, %v914_v30, %v916_v18  ;;  %1959 = vrot.lane.b32.xlu1 %v3876_v11, %s3086_s28  ;;  %v782_v1 = vadd.f32 %v773_v38, %v724_v33  ;;  %v831_v5 = vmul.f32 %v822_v53, %v3530_v25  ;;  %v1349_v30 = vmul.f32 %v1322_v49, %v3759_v4  ;;  %v3897_v25 = vld [vmem:[%s3148_s22] sm:$0xff] }
  0xe3   : > { %v1100_v58 = vadd.f32 %v1091_v0, %v1042_v50  ;;  %v1242_v6 = vadd.f32 %v1233_v3, %v3708_v36  ;;  %v964_v28 = vrot.slane %v921_v62, %v3264_v35  ;;  %v1022_v34 = vrot.slane %v921_v62, %v3269_v37 }
  0xe4   : > { %v1080_v36 = vrot.slane %v921_v62, %v3273_v39  ;;  %v1407_v42 = vmul.f32 %v1380_v45, %v3795_v48  ;;  %v1138_v12 = vrot.slane %v921_v62, %v3277_v41  ;;  %v840_v51 = vadd.f32 %v831_v5, %v782_v1 }
  0xe5   : > { %v3887_v15 = vadd.f32 %v1149_v27, %v1100_v58  ;;  %v1300_v9 = vadd.f32 %v1291_v57, %v1242_v6  ;;  %v976_v32 = vmul.f32 %v964_v28, %v3584_v56  ;;  %v1170_v44 = vpop.permute.xlu1 %1169  ;;  %v1034_v54 = vmul.f32 %v1022_v34, %v3599_v46  ;;  %v3909_v27 = vpop.permute.xlu0 %1425 }
  0xe6   : > { %v1187_v7 = vsel %vm1181_vm2, %v1168_v16, %v1170_v44  ;;  %2209 = vrot.lane.b32.xlu1 %v3897_v25, %s3091_s29  ;;  %v889_v33 = vmul.f32 %v880_v55, %v3557_v22  ;;  %v1092_v50 = vmul.f32 %v1080_v36, %v3623_v29  ;;  %v1150_v57 = vmul.f32 %v1138_v12, %v3651_v17  ;;  %v3917_v55 = vld [vmem:[%s3148_s22 + $0x8] sm:$0xff] }
  0xe7   : > { %v1358_v21 = vadd.f32 %v1349_v30, %v1300_v9  ;;  %v985_v53 = vadd.f32 %v976_v32, %v897_v59  ;;  %v1210_v47 = vrot.slane %v1187_v7, %v3264_v35  ;;  %v1268_v31 = vrot.slane %v1187_v7, %v3269_v37 }
  0xe8   : > { %v1326_v38 = vrot.slane %v1187_v7, %v3273_v39  ;;  %v1384_v62 = vrot.slane %v1187_v7, %v3277_v41  ;;  %v898_v59 = vadd.f32 %v889_v33, %v840_v51 }
  0xe9   : > { %v3905_v49 = vadd.f32 %v1407_v42, %v1358_v21  ;;  %v1043_v16 = vadd.f32 %v1034_v54, %v985_v53  ;;  %v1234_v0 = vmul.f32 %v1210_v47, %v3669_v60  ;;  %v918_v3 = vpop.permute.xlu1 %917  ;;  %v1292_v45 = vmul.f32 %v1268_v31, %v3719_v23  ;;  %v3938_v53 = vpop.permute.xlu0 %1512 }
  0xea   : > { %v920_v22 = vsel %vm919_vm1, %v916_v18, %v918_v3  ;;  %2213 = vrot.lane.b32.xlu1 %v3917_v55, %s3091_s29  ;;  %v1350_v1 = vmul.f32 %v1326_v38, %v3759_v4  ;;  %v1408_v36 = vmul.f32 %v1384_v62, %v3795_v48 }
  0xeb   : > { %v1101_v58 = vadd.f32 %v1092_v50, %v1043_v16  ;;  %v1243_v6 = vadd.f32 %v1234_v0, %v3753_v52  ;;  %v968_v28 = vrot.slane %v920_v22, %v3264_v35  ;;  %v1026_v34 = vrot.slane %v920_v22, %v3269_v37 }
  0xec   : > { %v1084_v9 = vrot.slane %v920_v22, %v3273_v39  ;;  %v1142_v52 = vrot.slane %v920_v22, %v3277_v41 }
  0xed   : > { %v3925_v5 = vadd.f32 %v1150_v57, %v1101_v58  ;;  %v1301_v30 = vadd.f32 %v1292_v45, %v1243_v6  ;;  %v977_v18 = vmul.f32 %v968_v28, %v3584_v56  ;;  %v1172_v32 = vpop.permute.xlu1 %1171  ;;  %v1035_v42 = vmul.f32 %v1026_v34, %v3599_v46  ;;  %v3962_v34 = vpop.permute.xlu0 %1570 }
  0xee   : > { %v1186_v54 = vsel %vm1181_vm2, %v1170_v44, %v1172_v32  ;;  %1961 = vrot.lane.b32.xlu1 %v3205_v19, %s3086_s28  ;;  %v1093_v44 = vmul.f32 %v1084_v9, %v3623_v29  ;;  %v1151_v38 = vmul.f32 %v1142_v52, %v3651_v17  ;;  %v3971_v9 = vld [vmem:[%s3148_s22 + $0x20] sm:$0xff] }
  0xef   : > { %v1359_v12 = vadd.f32 %v1350_v1, %v1301_v30  ;;  %v986_v7 = vadd.f32 %v977_v18, %v898_v59  ;;  %v1214_v21 = vrot.slane %v1186_v54, %v3264_v35  ;;  %v1272_v56 = vrot.slane %v1186_v54, %v3269_v37 }
  0xf0   : > { %v1330_v47 = vrot.slane %v1186_v54, %v3273_v39  ;;  %v1388_v50 = vrot.slane %v1186_v54, %v3277_v41 }
  0xf1   : > { %v3942_v46 = vadd.f32 %v1408_v36, %v1359_v12  ;;  %v1044_v31 = vadd.f32 %v1035_v42, %v986_v7  ;;  %v1235_v51 = vmul.f32 %v1214_v21, %v3669_v60  ;;  %v1174_v33 = vpop.permute.xlu1 %1173  ;;  %v1293_v16 = vmul.f32 %v1272_v56, %v3719_v23 }
  0xf2   : > { %v1185_v0 = vsel %vm1181_vm2, %v1172_v32, %v1174_v33  ;;  %2215 = vrot.lane.b32.xlu1 %v3169_v10, %s3091_s29  ;;  %v1351_v17 = vmul.f32 %v1330_v47, %v3759_v4 }
  0xf3   : > { %v1102_v3 = vadd.f32 %v1093_v44, %v1044_v31  ;;  %v1244_v57 = vadd.f32 %v1235_v51, %v3805_v20  ;;  %v1218_v29 = vrot.slane %v1185_v0, %v3264_v35  ;;  %v1276_v45 = vrot.slane %v1185_v0, %v3269_v37 }
  0xf4   : > { %v1392_v62 = vrot.slane %v1185_v0, %v3277_v41  ;;  %v1334_v28 = vrot.slane %v1185_v0, %v3273_v39  ;;  %v1409_v20 = vmul.f32 %v1388_v50, %v3795_v48 }
  0xf5   : > { %v3958_v22 = vadd.f32 %v1151_v38, %v1102_v3  ;;  %v1302_v58 = vadd.f32 %v1293_v16, %v1244_v57  ;;  %v1236_v6 = vmul.f32 %v1218_v29, %v3669_v60  ;;  %v1424_v59 = vpop.permute.xlu1 %1423  ;;  %v1294_v1 = vmul.f32 %v1276_v45, %v3719_v23  ;;  %v3991_v16 = vpop.permute.xlu0 %1628 }
  0xf6   : > { %v1410_v30 = vmul.f32 %v1392_v62, %v3795_v48  ;;  %v1452_v18 = vsel %vm1443_vm3, %v1424_v59, %v3909_v27  ;;  %1963 = vrot.lane.b32.xlu1 %v3971_v9, %s3086_s28  ;;  %v1352_v21 = vmul.f32 %v1334_v28, %v3759_v4 }
  0xf7   : > { %v1360_v32 = vadd.f32 %v1351_v17, %v1302_v58  ;;  %v1245_v36 = vadd.f32 %v1236_v6, %v3827_v63  ;;  %v1460_v42 = vrot.slane %v1452_v18, %v3264_v35  ;;  %v1518_v52 = vrot.slane %v1452_v18, %v3269_v37 }
  0xf8   : > { %v1576_v54 = vrot.slane %v1452_v18, %v3273_v39  ;;  %v1634_v44 = vrot.slane %v1452_v18, %v3277_v41 }
  0xf9   : > { %v3979_v12 = vadd.f32 %v1409_v20, %v1360_v32  ;;  %v1303_v7 = vadd.f32 %v1294_v1, %v1245_v36  ;;  %v1493_v56 = vmul.f32 %v1460_v42, %v3883_v14  ;;  %v1428_v47 = vpop.permute.xlu1 %1427  ;;  %v1551_v31 = vmul.f32 %v1518_v52, %v3938_v53 }
  0xfa   : > { %v1451_v63 = vsel %vm1443_vm3, %v3909_v27, %v1428_v47  ;;  %2217 = vrot.lane.b32.xlu1 %v3815_v61, %s3091_s29  ;;  %v1609_v3 = vmul.f32 %v1576_v54, %v3962_v34  ;;  %v1667_v6 = vmul.f32 %v1634_v44, %v3991_v16 }
  0xfb   : > { %v1361_v51 = vadd.f32 %v1352_v21, %v1303_v7  ;;  %v1502_v38 = vadd.f32 %v1493_v56, %v3848_v8  ;;  %v1464_v50 = vrot.slane %v1451_v63, %v3264_v35  ;;  %v1522_v0 = vrot.slane %v1451_v63, %v3269_v37 }
  0xfc   : > { %v1580_v27 = vrot.slane %v1451_v63, %v3273_v39  ;;  %v1638_v8 = vrot.slane %v1451_v63, %v3277_v41 }
  0xfd   : > { %v3996_v57 = vadd.f32 %v1410_v30, %v1361_v51  ;;  %v1560_v29 = vadd.f32 %v1551_v31, %v1502_v38  ;;  %v1494_v45 = vmul.f32 %v1464_v50, %v3883_v14  ;;  %v1176_v17 = vpop.permute.xlu1 %1175  ;;  %v1552_v62 = vmul.f32 %v1522_v0, %v3938_v53 }
  0xfe   : > { %v1184_v58 = vsel %vm1181_vm2, %v1174_v33, %v1176_v17  ;;  %1965 = vrot.lane.b32.xlu1 %v3225_v24, %s3086_s28  ;;  %v1610_v36 = vmul.f32 %v1580_v27, %v3962_v34  ;;  %v1668_v54 = vmul.f32 %v1638_v8, %v3991_v16 }
  0xff   : > { %v1618_v28 = vadd.f32 %v1609_v3, %v1560_v29  ;;  %v1503_v59 = vadd.f32 %v1494_v45, %v3866_v26  ;;  %v1222_v20 = vrot.slane %v1184_v58, %v3264_v35  ;;  %v1280_v1 = vrot.slane %v1184_v58, %v3269_v37 }
 0x100   : > { %v1338_v30 = vrot.slane %v1184_v58, %v3273_v39  ;;  %v1396_v18 = vrot.slane %v1184_v58, %v3277_v41 }
 0x101   : > { %v1561_v32 = vadd.f32 %v1552_v62, %v1503_v59  ;;  %v1237_v33 = vmul.f32 %v1222_v20, %v3669_v60  ;;  %v1430_v42 = vpop.permute.xlu1 %1429  ;;  %v4014_v52 = vadd.f32 %v1667_v6, %v1618_v28  ;;  %v1295_v26 = vmul.f32 %v1280_v1, %v3719_v23  ;;  %v4040_v6 = vpop.permute.xlu0 %1716 }
 0x102   : > { %v1411_v7 = vmul.f32 %v1396_v18, %v3795_v48  ;;  %v1450_v21 = vsel %vm1443_vm3, %v1428_v47, %v1430_v42  ;;  %2219 = vrot.lane.b32.xlu1 %v3183_v13, %s3091_s29  ;;  %v1353_v51 = vmul.f32 %v1338_v30, %v3759_v4 }
 0x103   : > { %v1619_v56 = vadd.f32 %v1610_v36, %v1561_v32  ;;  %v1246_v31 = vadd.f32 %v1237_v33, %v3887_v15  ;;  %v1468_v44 = vrot.slane %v1450_v21, %v3264_v35  ;;  %v1526_v63 = vrot.slane %v1450_v21, %v3269_v37 }
 0x104   : > { %v1584_v3 = vrot.slane %v1450_v21, %v3273_v39  ;;  %v1642_v45 = vrot.slane %v1450_v21, %v3277_v41 }
 0x105   : > { %v4027_v38 = vadd.f32 %v1668_v54, %v1619_v56  ;;  %v1304_v50 = vadd.f32 %v1295_v26, %v1246_v31  ;;  %v1495_v0 = vmul.f32 %v1468_v44, %v3883_v14  ;;  %v1178_v47 = vpop.permute.xlu1 %1177  ;;  %v1553_v29 = vmul.f32 %v1526_v63, %v3938_v53 }
 0x106   : > { %v1183_v15 = vsel %vm1181_vm2, %v1176_v17, %v1178_v47  ;;  %2221 = vrot.lane.b32.xlu1 %v3876_v11, %s3091_s29  ;;  %v1611_v17 = vmul.f32 %v1584_v3, %v3962_v34 }
 0x107   : > { %v1362_v27 = vadd.f32 %v1353_v51, %v1304_v50  ;;  %v1504_v62 = vadd.f32 %v1495_v0, %v3905_v49  ;;  %v1226_v8 = vrot.slane %v1183_v15, %v3264_v35  ;;  %v1284_v58 = vrot.slane %v1183_v15, %v3269_v37  ;;  %v4063_v51 = vpop.permute.xlu0 %1687 }
 0x108   : > { %v1342_v28 = vrot.slane %v1183_v15, %v3273_v39  ;;  %v1400_v59 = vrot.slane %v1183_v15, %v3277_v41  ;;  %v1669_v49 = vmul.f32 %v1642_v45, %v3991_v16 }
 0x109   : > { %v4044_v20 = vadd.f32 %v1411_v7, %v1362_v27  ;;  %v1562_v1 = vadd.f32 %v1553_v29, %v1504_v62  ;;  %v1238_v11 = vmul.f32 %v1226_v8, %v3669_v60  ;;  %v1432_v30 = vpop.permute.xlu1 %1431  ;;  %v1296_v18 = vmul.f32 %v1284_v58, %v3719_v23 }
 0x10a   : > { %v1412_v32 = vmul.f32 %v1400_v59, %v3795_v48  ;;  %v1449_v36 = vsel %vm1443_vm3, %v1430_v42, %v1432_v30  ;;  %2471 = vrot.lane.b32.xlu1 %v3897_v25, %s3096_s30  ;;  %v1354_v21 = vmul.f32 %v1342_v28, %v3759_v4 }
 0x10b   : > { %v1620_v33 = vadd.f32 %v1611_v17, %v1562_v1  ;;  %v1247_v54 = vadd.f32 %v1238_v11, %v3925_v5  ;;  %v1472_v26 = vrot.slane %v1449_v36, %v3264_v35  ;;  %v1530_v7 = vrot.slane %v1449_v36, %v3269_v37 }
 0x10c   : > { %v1588_v63 = vrot.slane %v1449_v36, %v3273_v39  ;;  %v1646_v5 = vrot.slane %v1449_v36, %v3277_v41 }
 0x10d   : > { %v4059_v56 = vadd.f32 %v1669_v49, %v1620_v33  ;;  %v1305_v31 = vadd.f32 %v1296_v18, %v1247_v54  ;;  %v1496_v44 = vmul.f32 %v1472_v26, %v3883_v14  ;;  %v1180_v42 = vpop.permute.xlu1 %1179  ;;  %v1554_v25 = vmul.f32 %v1530_v7, %v3938_v53  ;;  %v4090_v18 = vpop.permute.xlu0 %1774 }
 0x10e   : > { %v1182_v50 = vsel %vm1181_vm2, %v1178_v47, %v1180_v42  ;;  %2475 = vrot.lane.b32.xlu1 %v3917_v55, %s3096_s30  ;;  %v1612_v58 = vmul.f32 %v1588_v63, %v3962_v34  ;;  %v1670_v55 = vmul.f32 %v1646_v5, %v3991_v16 }
 0x10f   : > { %v1363_v0 = vadd.f32 %v1354_v21, %v1305_v31  ;;  %v1505_v3 = vadd.f32 %v1496_v44, %v3942_v46  ;;  %v1230_v29 = vrot.slane %v1182_v50, %v3264_v35  ;;  %v1288_v45 = vrot.slane %v1182_v50, %v3269_v37 }
 0x110   : > { %v1346_v15 = vrot.slane %v1182_v50, %v3273_v39  ;;  %v1404_v27 = vrot.slane %v1182_v50, %v3277_v41 }
 0x111   : > { %v4076_v62 = vadd.f32 %v1412_v32, %v1363_v0  ;;  %v1563_v8 = vadd.f32 %v1554_v25, %v1505_v3  ;;  %v1239_v47 = vmul.f32 %v1230_v29, %v3669_v60  ;;  %v1434_v28 = vpop.permute.xlu1 %1433  ;;  %v1297_v46 = vmul.f32 %v1288_v45, %v3719_v23  ;;  %v4112_v50 = vpop.permute.xlu0 %1832 }
 0x112   : > { %v1413_v59 = vmul.f32 %v1404_v27, %v3795_v48  ;;  %v1448_v1 = vsel %vm1443_vm3, %v1432_v30, %v1434_v28  ;;  %2223 = vrot.lane.b32.xlu1 %v3205_v19, %s3091_s29  ;;  %v1355_v32 = vmul.f32 %v1346_v15, %v3759_v4 }
 0x113   : > { %v1621_v17 = vadd.f32 %v1612_v58, %v1563_v8  ;;  %v1248_v11 = vadd.f32 %v1239_v47, %v3958_v22  ;;  %v1476_v49 = vrot.slane %v1448_v1, %v3264_v35  ;;  %v1534_v60 = vrot.slane %v1448_v1, %v3269_v37 }
 0x114   : > { %v1592_v30 = vrot.slane %v1448_v1, %v3273_v39  ;;  %v1650_v22 = vrot.slane %v1448_v1, %v3277_v41 }
 0x115   : > { %v4093_v23 = vadd.f32 %v1670_v55, %v1621_v17  ;;  %v1306_v48 = vadd.f32 %v1297_v46, %v1248_v11  ;;  %v1497_v36 = vmul.f32 %v1476_v49, %v3883_v14  ;;  %v1436_v33 = vpop.permute.xlu1 %1435  ;;  %v1555_v54 = vmul.f32 %v1534_v60, %v3938_v53  ;;  %v4139_v60 = vpop.permute.xlu0 %1890 }
 0x116   : > { %v1447_v26 = vsel %vm1443_vm3, %v1434_v28, %v1436_v33  ;;  %2477 = vrot.lane.b32.xlu1 %v3169_v10, %s3096_s30  ;;  %v1613_v25 = vmul.f32 %v1592_v30, %v3962_v34  ;;  %v1671_v10 = vmul.f32 %v1650_v22, %v3991_v16 }
 0x117   : > { %v1364_v4 = vadd.f32 %v1355_v32, %v1306_v48  ;;  %v1506_v7 = vadd.f32 %v1497_v36, %v3979_v12  ;;  %v1480_v21 = vrot.slane %v1447_v26, %v3264_v35  ;;  %v1538_v31 = vrot.slane %v1447_v26, %v3269_v37 }
 0x118   : > { %v1596_v44 = vrot.slane %v1447_v26, %v3273_v39  ;;  %v1654_v3 = vrot.slane %v1447_v26, %v3277_v41 }
 0x119   : > { %v4108_v63 = vadd.f32 %v1413_v59, %v1364_v4  ;;  %v1564_v42 = vadd.f32 %v1555_v54, %v1506_v7  ;;  %v1498_v5 = vmul.f32 %v1480_v21, %v3883_v14  ;;  %v1686_v0 = vpop.permute.xlu1 %1685  ;;  %v1556_v12 = vmul.f32 %v1538_v31, %v3938_v53 }
 0x11a   : > { %v1714_v29 = vsel %vm1705_vm4, %v1686_v0, %v4063_v51  ;;  %2225 = vrot.lane.b32.xlu1 %v3971_v9, %s3091_s29  ;;  %v1614_v58 = vmul.f32 %v1596_v44, %v3962_v34  ;;  %v1672_v1 = vmul.f32 %v1654_v3, %v3991_v16 }
 0x11b   : > { %v1622_v45 = vadd.f32 %v1613_v25, %v1564_v42  ;;  %v1507_v15 = vadd.f32 %v1498_v5, %v3996_v57  ;;  %v1722_v27 = vrot.slane %v1714_v29, %v3264_v35  ;;  %v1780_v8 = vrot.slane %v1714_v29, %v3269_v37 }
 0x11c   : > { %v1838_v46 = vrot.slane %v1714_v29, %v3273_v39  ;;  %v1896_v57 = vrot.slane %v1714_v29, %v3277_v41 }
 0x11d   : > { %v4126_v47 = vadd.f32 %v1671_v10, %v1622_v45  ;;  %v1565_v28 = vadd.f32 %v1556_v12, %v1507_v15  ;;  %v1755_v55 = vmul.f32 %v1722_v27, %v4040_v6  ;;  %v1690_v59 = vpop.permute.xlu1 %1689  ;;  %v1813_v9 = vmul.f32 %v1780_v8, %v4090_v18 }
 0x11e   : > { %v1713_v17 = vsel %vm1705_vm4, %v4063_v51, %v1690_v59  ;;  %2479 = vrot.lane.b32.xlu1 %v3815_v61, %s3096_s30  ;;  %v1871_v22 = vmul.f32 %v1838_v46, %v4112_v50  ;;  %v1929_v7 = vmul.f32 %v1896_v57, %v4139_v60 }
 0x11f   : > { %v1623_v11 = vadd.f32 %v1614_v58, %v1565_v28  ;;  %v1764_v49 = vadd.f32 %v1755_v55, %v4014_v52  ;;  %v1726_v32 = vrot.slane %v1713_v17, %v3264_v35  ;;  %v1784_v48 = vrot.slane %v1713_v17, %v3269_v37 }
 0x120   : > { %v1842_v36 = vrot.slane %v1713_v17, %v3273_v39  ;;  %v1900_v52 = vrot.slane %v1713_v17, %v3277_v41 }
 0x121   : > { %v4144_v30 = vadd.f32 %v1672_v1, %v1623_v11  ;;  %v1822_v54 = vadd.f32 %v1813_v9, %v1764_v49  ;;  %v1756_v51 = vmul.f32 %v1726_v32, %v4040_v6  ;;  %v1438_v26 = vpop.permute.xlu1 %1437  ;;  %v1814_v61 = vmul.f32 %v1784_v48, %v4090_v18 }
 0x122   : > { %v1446_v4 = vsel %vm1443_vm3, %v1436_v33, %v1438_v26  ;;  %2227 = vrot.lane.b32.xlu1 %v3225_v24, %s3091_s29  ;;  %v1872_v25 = vmul.f32 %v1842_v36, %v4112_v50  ;;  %v1930_v3 = vmul.f32 %v1900_v52, %v4139_v60  ;;  %v4188_v36 = vpop.permute.xlu0 %1978 }
 0x123   : > { %v1880_v21 = vadd.f32 %v1871_v22, %v1822_v54  ;;  %v1765_v31 = vadd.f32 %v1756_v51, %v4027_v38  ;;  %v1484_v44 = vrot.slane %v1446_v4, %v3264_v35  ;;  %v1542_v42 = vrot.slane %v1446_v4, %v3269_v37 }
 0x124   : > { %v1600_v10 = vrot.slane %v1446_v4, %v3273_v39  ;;  %v1658_v38 = vrot.slane %v1446_v4, %v3277_v41 }
 0x125   : > { %v1823_v5 = vadd.f32 %v1814_v61, %v1765_v31  ;;  %v1499_v0 = vmul.f32 %v1484_v44, %v3883_v14  ;;  %v1692_v33 = vpop.permute.xlu1 %1691  ;;  %v4161_v12 = vadd.f32 %v1929_v7, %v1880_v21  ;;  %v1557_v29 = vmul.f32 %v1542_v42, %v3938_v53 }
 0x126   : > { %v1712_v45 = vsel %vm1705_vm4, %v1690_v59, %v1692_v33  ;;  %2481 = vrot.lane.b32.xlu1 %v3183_v13, %s3096_s30  ;;  %v1615_v1 = vmul.f32 %v1600_v10, %v3962_v34  ;;  %v1673_v57 = vmul.f32 %v1658_v38, %v3991_v16  ;;  %v4211_v38 = vpop.permute.xlu0 %1949 }
 0x127   : > { %v1881_v15 = vadd.f32 %v1872_v25, %v1823_v5  ;;  %v1508_v27 = vadd.f32 %v1499_v0, %v4044_v20  ;;  %v1730_v8 = vrot.slane %v1712_v45, %v3264_v35  ;;  %v1788_v58 = vrot.slane %v1712_v45, %v3269_v37 }
 0x128   : > { %v1846_v28 = vrot.slane %v1712_v45, %v3273_v39  ;;  %v1904_v20 = vrot.slane %v1712_v45, %v3277_v41 }
 0x129   : > { %v4174_v55 = vadd.f32 %v1930_v3, %v1881_v15  ;;  %v1566_v46 = vadd.f32 %v1557_v29, %v1508_v27  ;;  %v1757_v9 = vmul.f32 %v1730_v8, %v4040_v6  ;;  %v1440_v59 = vpop.permute.xlu1 %1439  ;;  %v1815_v13 = vmul.f32 %v1788_v58, %v4090_v18 }
 0x12a   : > { %v1445_v17 = vsel %vm1443_vm3, %v1438_v26, %v1440_v59  ;;  %2485 = vrot.lane.b32.xlu1 %v3205_v19, %s3096_s30  ;;  %v1873_v54 = vmul.f32 %v1846_v28, %v4112_v50 }
 0x12b   : > { %v1624_v11 = vadd.f32 %v1615_v1, %v1566_v46  ;;  %v1766_v49 = vadd.f32 %v1757_v9, %v4059_v56  ;;  %v1488_v32 = vrot.slane %v1445_v17, %v3264_v35  ;;  %v1546_v48 = vrot.slane %v1445_v17, %v3269_v37 }
 0x12c   : > { %v1662_v22 = vrot.slane %v1445_v17, %v3277_v41  ;;  %v1604_v19 = vrot.slane %v1445_v17, %v3273_v39  ;;  %v1931_v56 = vmul.f32 %v1904_v20, %v4139_v60 }
 0x12d   : > { %v4192_v51 = vadd.f32 %v1673_v57, %v1624_v11  ;;  %v1824_v61 = vadd.f32 %v1815_v13, %v1766_v49  ;;  %v1500_v26 = vmul.f32 %v1488_v32, %v3883_v14  ;;  %v1694_v52 = vpop.permute.xlu1 %1693  ;;  %v1558_v4 = vmul.f32 %v1546_v48, %v3938_v53 }
 0x12e   : > { %v1674_v7 = vmul.f32 %v1662_v22, %v3991_v16  ;;  %v1711_v21 = vsel %vm1705_vm4, %v1692_v33, %v1694_v52  ;;  %2489 = vrot.lane.b32.xlu1 %v3225_v24, %s3096_s30  ;;  %v1616_v3 = vmul.f32 %v1604_v19, %v3962_v34 }
 0x12f   : > { %v1882_v31 = vadd.f32 %v1873_v54, %v1824_v61  ;;  %v1509_v44 = vadd.f32 %v1500_v26, %v4076_v62  ;;  %v1734_v42 = vrot.slane %v1711_v21, %v3264_v35  ;;  %v1792_v25 = vrot.slane %v1711_v21, %v3269_v37 }
 0x130   : > { %v1850_v5 = vrot.slane %v1711_v21, %v3273_v39  ;;  %v1908_v62 = vrot.slane %v1711_v21, %v3277_v41 }
 0x131   : > { %v4207_v0 = vadd.f32 %v1931_v56, %v1882_v31  ;;  %v1567_v10 = vadd.f32 %v1558_v4, %v1509_v44  ;;  %v1758_v29 = vmul.f32 %v1734_v42, %v4040_v6  ;;  %v1442_v33 = vpop.permute.xlu1 %1441  ;;  %v1816_v24 = vmul.f32 %v1792_v25, %v4090_v18 }
 0x132   : > { %v1444_v45 = vsel %vm1443_vm3, %v1440_v59, %v1442_v33  ;;  %v1874_v28 = vmul.f32 %v1850_v5, %v4112_v50  ;;  %v1932_v59 = vmul.f32 %v1908_v62, %v4139_v60 }
 0x133   : > { %v1625_v15 = vadd.f32 %v1616_v3, %v1567_v10  ;;  %v1767_v27 = vadd.f32 %v1758_v29, %v4093_v23  ;;  %v1492_v8 = vrot.slane %v1444_v45, %v3264_v35  ;;  %v1550_v58 = vrot.slane %v1444_v45, %v3269_v37 }
 0x134   : > { %v1666_v46 = vrot.slane %v1444_v45, %v3277_v41  ;;  %v1608_v13 = vrot.slane %v1444_v45, %v3273_v39 }
 0x135   : > { %v4222_v1 = vadd.f32 %v1674_v7, %v1625_v15  ;;  %v1825_v9 = vadd.f32 %v1816_v24, %v1767_v27  ;;  %v1501_v57 = vmul.f32 %v1492_v8, %v3883_v14  ;;  %v1696_v20 = vpop.permute.xlu1 %1695  ;;  %v1559_v23 = vmul.f32 %v1550_v58, %v3938_v53  ;;  %v4234_v14 = vpop.permute.xlu0 %2036 }
 0x136   : > { %v1675_v17 = vmul.f32 %v1666_v46, %v3991_v16  ;;  %v1710_v11 = vsel %vm1705_vm4, %v1694_v52, %v1696_v20  ;;  %v1617_v53 = vmul.f32 %v1608_v13, %v3962_v34 }
 0x137   : > { %v1883_v49 = vadd.f32 %v1874_v28, %v1825_v9  ;;  %v1510_v32 = vadd.f32 %v1501_v57, %v4108_v63  ;;  %v1738_v48 = vrot.slane %v1710_v11, %v3264_v35  ;;  %v1796_v54 = vrot.slane %v1710_v11, %v3269_v37 }
 0x138   : > { %v1854_v22 = vrot.slane %v1710_v11, %v3273_v39  ;;  %v1912_v63 = vrot.slane %v1710_v11, %v3277_v41 }
 0x139   : > { %v4237_v61 = vadd.f32 %v1932_v59, %v1883_v49  ;;  %v1568_v26 = vadd.f32 %v1559_v23, %v1510_v32  ;;  %v1759_v16 = vmul.f32 %v1738_v48, %v4040_v6  ;;  %v1698_v19 = vpop.permute.xlu1 %1697  ;;  %v1817_v52 = vmul.f32 %v1796_v54, %v4090_v18  ;;  %v4254_v10 = vpop.permute.xlu0 %2094 }
 0x13a   : > { %v1709_v56 = vsel %vm1705_vm4, %v1696_v20, %v1698_v19  ;;  %v1875_v34 = vmul.f32 %v1854_v22, %v4112_v50  ;;  %v1933_v29 = vmul.f32 %v1912_v63, %v4139_v60 }
 0x13b   : > { %v1626_v4 = vadd.f32 %v1617_v53, %v1568_v26  ;;  %v1768_v7 = vadd.f32 %v1759_v16, %v4126_v47  ;;  %v1742_v21 = vrot.slane %v1709_v56, %v3264_v35  ;;  %v1800_v31 = vrot.slane %v1709_v56, %v3269_v37 }
 0x13c   : > { %v1858_v5 = vrot.slane %v1709_v56, %v3273_v39  ;;  %v1916_v33 = vrot.slane %v1709_v56, %v3277_v41 }
 0x13d   : > { %v4250_v44 = vadd.f32 %v1675_v17, %v1626_v4  ;;  %v1826_v42 = vadd.f32 %v1817_v52, %v1768_v7  ;;  %v1760_v25 = vmul.f32 %v1742_v21, %v4040_v6  ;;  %v1948_v3 = vpop.permute.xlu1 %1947  ;;  %v1818_v47 = vmul.f32 %v1800_v31, %v4090_v18  ;;  %v4277_v11 = vpop.permute.xlu0 %2152 }
 0x13e   : > { %v1976_v24 = vsel %vm1967_vm5, %v1948_v3, %v4211_v38  ;;  %v1876_v46 = vmul.f32 %v1858_v5, %v4112_v50  ;;  %v1934_v13 = vmul.f32 %v1916_v33, %v4139_v60 }
 0x13f   : > { %v1884_v62 = vadd.f32 %v1875_v34, %v1826_v42  ;;  %v1769_v45 = vadd.f32 %v1760_v25, %v4144_v30  ;;  %v1984_v15 = vrot.slane %v1976_v24, %v3264_v35  ;;  %v2042_v27 = vrot.slane %v1976_v24, %v3269_v37 }
 0x140   : > { %v2100_v8 = vrot.slane %v1976_v24, %v3273_v39  ;;  %v2158_v30 = vrot.slane %v1976_v24, %v3277_v41 }
 0x141   : > { %v4266_v58 = vadd.f32 %v1933_v29, %v1884_v62  ;;  %v1827_v28 = vadd.f32 %v1818_v47, %v1769_v45  ;;  %v2017_v9 = vmul.f32 %v1984_v15, %v4188_v36  ;;  %v1952_v57 = vpop.permute.xlu1 %1951  ;;  %v2075_v20 = vmul.f32 %v2042_v27, %v4234_v14 }
 0x142   : > { %v1975_v59 = vsel %vm1967_vm5, %v4211_v38, %v1952_v57  ;;  %v2133_v48 = vmul.f32 %v2100_v8, %v4254_v10  ;;  %v2191_v63 = vmul.f32 %v2158_v30, %v4277_v11 }
 0x143   : > { %v1885_v23 = vadd.f32 %v1876_v46, %v1827_v28  ;;  %v2026_v17 = vadd.f32 %v2017_v9, %v4161_v12  ;;  %v1988_v49 = vrot.slane %v1975_v59, %v3264_v35  ;;  %v2046_v32 = vrot.slane %v1975_v59, %v3269_v37 }
 0x144   : > { %v2104_v53 = vrot.slane %v1975_v59, %v3273_v39  ;;  %v2162_v12 = vrot.slane %v1975_v59, %v3277_v41 }
 0x145   : > { %v4282_v54 = vadd.f32 %v1934_v13, %v1885_v23  ;;  %v2084_v22 = vadd.f32 %v2075_v20, %v2026_v17  ;;  %v2018_v26 = vmul.f32 %v1988_v49, %v4188_v36  ;;  %v1700_v16 = vpop.permute.xlu1 %1699  ;;  %v2076_v38 = vmul.f32 %v2046_v32, %v4234_v14 }
 0x146   : > { %v1708_v52 = vsel %vm1705_vm4, %v1698_v19, %v1700_v16  ;;  %v2134_v42 = vmul.f32 %v2104_v53, %v4254_v10  ;;  %v2192_v19 = vmul.f32 %v2162_v12, %v4277_v11 }
 0x147   : > { %v2142_v56 = vadd.f32 %v2133_v48, %v2084_v22  ;;  %v2027_v4 = vadd.f32 %v2018_v26, %v4174_v55  ;;  %v1746_v7 = vrot.slane %v1708_v52, %v3264_v35  ;;  %v1804_v21 = vrot.slane %v1708_v52, %v3269_v37 }
 0x148   : > { %v1862_v31 = vrot.slane %v1708_v52, %v3273_v39  ;;  %v1920_v55 = vrot.slane %v1708_v52, %v3277_v41 }
 0x149   : > { %v2085_v34 = vadd.f32 %v2076_v38, %v2027_v4  ;;  %v1761_v25 = vmul.f32 %v1746_v7, %v4040_v6  ;;  %v1954_v5 = vpop.permute.xlu1 %1953  ;;  %v4297_v3 = vadd.f32 %v2191_v63, %v2142_v56  ;;  %v1819_v29 = vmul.f32 %v1804_v21, %v4090_v18 }
 0x14a   : > { %v1974_v47 = vsel %vm1967_vm5, %v1952_v57, %v1954_v5  ;;  %v1877_v15 = vmul.f32 %v1862_v31, %v4112_v50  ;;  %v1935_v13 = vmul.f32 %v1920_v55, %v4139_v60 }
 0x14b   : > { %v2143_v33 = vadd.f32 %v2134_v42, %v2085_v34  ;;  %v1770_v24 = vadd.f32 %v1761_v25, %v4192_v51  ;;  %v1992_v62 = vrot.slane %v1974_v47, %v3264_v35  ;;  %v2050_v45 = vrot.slane %v1974_v47, %v3269_v37 }
 0x14c   : > { %v2108_v46 = vrot.slane %v1974_v47, %v3273_v39  ;;  %v2166_v51 = vrot.slane %v1974_v47, %v3277_v41 }
 0x14d   : > { %v4308_v27 = vadd.f32 %v2192_v19, %v2143_v33  ;;  %v1828_v8 = vadd.f32 %v1819_v29, %v1770_v24  ;;  %v2019_v28 = vmul.f32 %v1992_v62, %v4188_v36  ;;  %v1702_v9 = vpop.permute.xlu1 %1701  ;;  %v2077_v57 = vmul.f32 %v2050_v45, %v4234_v14 }
 0x14e   : > { %v1707_v20 = vsel %vm1705_vm4, %v1700_v16, %v1702_v9  ;;  %v2135_v22 = vmul.f32 %v2108_v46, %v4254_v10  ;;  %v2193_v38 = vmul.f32 %v2166_v51, %v4277_v11 }
 0x14f   : > { %v1886_v30 = vadd.f32 %v1877_v15, %v1828_v8  ;;  %v2028_v59 = vadd.f32 %v2019_v28, %v4207_v0  ;;  %v1750_v23 = vrot.slane %v1707_v20, %v3264_v35  ;;  %v1808_v17 = vrot.slane %v1707_v20, %v3269_v37 }
 0x150   : > { %v1866_v49 = vrot.slane %v1707_v20, %v3273_v39  ;;  %v1924_v0 = vrot.slane %v1707_v20, %v3277_v41 }
 0x151   : > { %v4321_v32 = vadd.f32 %v1935_v13, %v1886_v30  ;;  %v2086_v48 = vadd.f32 %v2077_v57, %v2028_v59  ;;  %v1762_v26 = vmul.f32 %v1750_v23, %v4040_v6  ;;  %v1956_v53 = vpop.permute.xlu1 %1955  ;;  %v1820_v16 = vmul.f32 %v1808_v17, %v4090_v18 }
 0x152   : > { %v1973_v12 = vsel %vm1967_vm5, %v1954_v5, %v1956_v53  ;;  %v1878_v7 = vmul.f32 %v1866_v49, %v4112_v50  ;;  %v1936_v19 = vmul.f32 %v1924_v0, %v4139_v60 }
 0x153   : > { %v2144_v52 = vadd.f32 %v2135_v22, %v2086_v48  ;;  %v1771_v63 = vadd.f32 %v1762_v26, %v4222_v1  ;;  %v1996_v56 = vrot.slane %v1973_v12, %v3264_v35  ;;  %v2054_v4 = vrot.slane %v1973_v12, %v3269_v37 }
 0x154   : > { %v2112_v42 = vrot.slane %v1973_v12, %v3273_v39  ;;  %v2170_v1 = vrot.slane %v1973_v12, %v3277_v41 }
 0x155   : > { %v4334_v21 = vadd.f32 %v2193_v38, %v2144_v52  ;;  %v1829_v31 = vadd.f32 %v1820_v16, %v1771_v63  ;;  %v2020_v34 = vmul.f32 %v1996_v56, %v4188_v36  ;;  %v1704_v25 = vpop.permute.xlu1 %1703  ;;  %v2078_v5 = vmul.f32 %v2054_v4, %v4234_v14 }
 0x156   : > { %v1706_v29 = vsel %vm1705_vm4, %v1702_v9, %v1704_v25  ;;  %v2136_v8 = vmul.f32 %v2112_v42, %v4254_v10  ;;  %v2194_v13 = vmul.f32 %v2170_v1, %v4277_v11  ;;  %v4352_v9 = vpop.permute.xlu0 %2240 }
 0x157   : > { %v1887_v55 = vadd.f32 %v1878_v7, %v1829_v31  ;;  %v2029_v47 = vadd.f32 %v2020_v34, %v4237_v61  ;;  %v1754_v33 = vrot.slane %v1706_v29, %v3264_v35  ;;  %v1812_v24 = vrot.slane %v1706_v29, %v3269_v37 }
 0x158   : > { %v1870_v62 = vrot.slane %v1706_v29, %v3273_v39  ;;  %v1928_v57 = vrot.slane %v1706_v29, %v3277_v41 }
 0x159   : > { %v4347_v45 = vadd.f32 %v1936_v19, %v1887_v55  ;;  %v2087_v15 = vadd.f32 %v2078_v5, %v2029_v47  ;;  %v1763_v28 = vmul.f32 %v1754_v33, %v4040_v6  ;;  %v1958_v46 = vpop.permute.xlu1 %1957  ;;  %v1821_v61 = vmul.f32 %v1812_v24, %v4090_v18  ;;  %v4393_v47 = vld [vmem:[%s4766_s3] sm:$0xff] }
 0x15a   : > { %v1972_v51 = vsel %vm1967_vm5, %v1956_v53, %v1958_v46  ;;  %v1879_v6 = vmul.f32 %v1870_v62, %v4112_v50  ;;  %v1937_v26 = vmul.f32 %v1928_v57, %v4139_v60  ;;  %v2212_v0 = vpop.permute.xlu0 %2211 }
 0x15b   : > { %v2145_v20 = vadd.f32 %v2136_v8, %v2087_v15  ;;  %v1772_v30 = vadd.f32 %v1763_v28, %v4250_v44  ;;  %v2000_v59 = vrot.slane %v1972_v51, %v3264_v35  ;;  %v2058_v23 = vrot.slane %v1972_v51, %v3269_v37 }
 0x15c   : > { %v2116_v18 = vrot.slane %v1972_v51, %v3273_v39  ;;  %v2174_v53 = vrot.slane %v1972_v51, %v3277_v41 }
 0x15d   : > { %v4362_v17 = vadd.f32 %v2194_v13, %v2145_v20  ;;  %v1830_v49 = vadd.f32 %v1821_v61, %v1772_v30  ;;  %v2021_v48 = vmul.f32 %v2000_v59, %v4188_v36  ;;  %v1960_v22 = vpop.permute.xlu1 %1959  ;;  %v2079_v16 = vmul.f32 %v2058_v23, %v4234_v14 }
 0x15e   : > { %v1971_v50 = vsel %vm1967_vm5, %v1958_v46, %v1960_v22  ;;  %v2137_v63 = vmul.f32 %v2116_v18, %v4254_v10  ;;  %v2195_v7 = vmul.f32 %v2174_v53, %v4277_v11  ;;  %v4380_v34 = vpop.permute.xlu0 %2298  ;;  %v4407_v13 = vrot.slane %v4393_v47, %v3264_v35 }
 0x15f   : > { %v1888_v38 = vadd.f32 %v1879_v6, %v1830_v49  ;;  %v2030_v44 = vadd.f32 %v2021_v48, %v4266_v58  ;;  %v2004_v4 = vrot.slane %v1971_v50, %v3264_v35  ;;  %v2062_v19 = vrot.slane %v1971_v50, %v3269_v37 }
 0x160   : > { %v2120_v24 = vrot.slane %v1971_v50, %v3273_v39  ;;  %v4411_v61 = vrot.slane %v4393_v47, %v3269_v37  ;;  %v2178_v57 = vrot.slane %v1971_v50, %v3277_v41  ;;  %v4418_v20 = vrot.slane %v4393_v47, %v3273_v39 }
 0x161   : > { %v4372_v12 = vadd.f32 %v1937_v26, %v1888_v38  ;;  %v2088_v52 = vadd.f32 %v2079_v16, %v2030_v44  ;;  %v2210_v56 = vpop.permute.xlu1 %2209  ;;  %v2022_v42 = vmul.f32 %v2004_v4, %v4188_v36  ;;  %v2080_v33 = vmul.f32 %v2062_v19, %v4234_v14  ;;  %v4780_v26 = vld [vmem:[#allocation2_spill] sm:$0xff]  ;;  %v4781_v38 = vld [vmem:[#allocation3_spill] sm:$0xff] }
 0x162   : > { %v2238_v25 = vsel %vm2229_vm6, %v2210_v56, %v2212_v0  ;;  %v4397_v62 = vpop.permute.xlu0 %2356  ;;  %v4422_v30 = vrot.slane %v4393_v47, %v3277_v41  ;;  %v2138_v59 = vmul.f32 %v2120_v24, %v4254_v10  ;;  %v4435_v53 = vrot.slane %v4393_v47, %v4780_v26 }
 0x163   : > { %v2146_v60 = vadd.f32 %v2137_v63, %v2088_v52  ;;  %v2031_v29 = vadd.f32 %v2022_v42, %v4282_v54  ;;  %v2246_v55 = vrot.slane %v2238_v25, %v3264_v35  ;;  %v2304_v23 = vrot.slane %v2238_v25, %v3269_v37 }
 0x164   : > { %v2362_v48 = vrot.slane %v2238_v25, %v3273_v39  ;;  %v2420_v18 = vrot.slane %v2238_v25, %v3277_v41  ;;  %v4439_v44 = vrot.slane %v4393_v47, %v4781_v38  ;;  %v2196_v56 = vmul.f32 %v2178_v57, %v4277_v11 }
 0x165   : > { %v4378_v58 = vadd.f32 %v2195_v7, %v2146_v60  ;;  %v2214_v31 = vpop.permute.xlu1 %2213  ;;  %v2089_v28 = vadd.f32 %v2080_v33, %v2031_v29  ;;  %v2279_v46 = vmul.f32 %v2246_v55, %v4352_v9  ;;  %v4465_v33 = vrot.slane %v4393_v47, %v3275_v40 }
 0x166   : > { %v2237_v5 = vsel %vm2229_vm6, %v2212_v0, %v2214_v31  ;;  %v4442_v0 = vpop.permute.xlu0 %2414  ;;  %v2395_v19 = vmul.f32 %v2362_v48, %v4397_v62 }
 0x167   : > { %v2250_v15 = vrot.slane %v2237_v5, %v3264_v35  ;;  %v2147_v16 = vadd.f32 %v2138_v59, %v2089_v28  ;;  %v2288_v50 = vadd.f32 %v2279_v46, %v4297_v3  ;;  %v2308_v52 = vrot.slane %v2237_v5, %v3269_v37 }
 0x168   : > { %v2337_v3 = vmul.f32 %v2304_v23, %v4380_v34  ;;  %v2366_v42 = vrot.slane %v2237_v5, %v3273_v39  ;;  %v2424_v25 = vrot.slane %v2237_v5, %v3277_v41  ;;  %v2453_v55 = vmul.f32 %v2420_v18, %v4442_v0 }
 0x169   : > { %v1962_v1 = vpop.permute.xlu1 %1961  ;;  %v2280_v6 = vmul.f32 %v2250_v15, %v4352_v9  ;;  %v4467_v24 = vadd.f32 %v2196_v56, %v2147_v16 }
 0x16a   : > { %v4402_v8 = vsel %vm1967_vm5, %v1960_v22, %v1962_v1  ;;  %v2346_v15 = vadd.f32 %v2337_v3, %v2288_v50  ;;  %v4479_v40 = vpop.permute.xlu0 %2502  ;;  %v2396_v23 = vmul.f32 %v2366_v42, %v4397_v62 }
 0x16b   : > { %v2008_v51 = vrot.slane %v4402_v8, %v3264_v35  ;;  %v2182_v50 = vrot.slane %v4402_v8, %v3277_v41 }
 0x16c   : > { %v2404_v16 = vadd.f32 %v2395_v19, %v2346_v15 }
 0x16d   : > { %v2216_v54 = vpop.permute.xlu1 %2215  ;;  %v2023_v4 = vmul.f32 %v2008_v51, %v4188_v36 }
 0x16e   : > { %v4429_v49 = vsel %vm2229_vm6, %v2214_v31, %v2216_v54  ;;  %v2289_v31 = vadd.f32 %v2280_v6, %v4308_v27  ;;  %v2338_v27 = vmul.f32 %v2308_v52, %v4380_v34  ;;  %v2454_v6 = vmul.f32 %v2424_v25, %v4442_v0 }
 0x16f   : > { %v2254_v60 = vrot.slane %v4429_v49, %v3264_v35  ;;  %v2032_v28 = vadd.f32 %v2023_v4, %v4321_v32  ;;  %v2312_v32 = vrot.slane %v4429_v49, %v3269_v37 }
 0x170   : > { %v2347_v59 = vadd.f32 %v2338_v27, %v2289_v31 }
 0x171   : > { %v1964_v22 = vpop.permute.xlu1 %1963  ;;  %v2281_v46 = vmul.f32 %v2254_v60, %v4352_v9  ;;  %v2339_v19 = vmul.f32 %v2312_v32, %v4380_v34 }
 0x172   : > { %v4447_v63 = vsel %vm1967_vm5, %v1962_v1, %v1964_v22  ;;  %v2066_v1 = vrot.slane %v4402_v8, %v3269_v37  ;;  %v2405_v31 = vadd.f32 %v2396_v23, %v2347_v59 }
 0x173   : > { %v2012_v7 = vrot.slane %v4447_v63, %v3264_v35  ;;  %v2070_v18 = vrot.slane %v4447_v63, %v3269_v37  ;;  %v2290_v60 = vadd.f32 %v2281_v46, %v4334_v21 }
 0x174   : > { %v2081_v48 = vmul.f32 %v2066_v1, %v4234_v14  ;;  %v2474_v1 = vpop.permute.xlu0 %2473  ;;  %v4516_v23 = vadd.f32 %v2454_v6, %v2405_v31 }
 0x175   : > { %v2218_v29 = vpop.permute.xlu1 %2217  ;;  %v2024_v57 = vmul.f32 %v2012_v7, %v4188_v36  ;;  %v2082_v21 = vmul.f32 %v2070_v18, %v4234_v14  ;;  %v2348_v59 = vadd.f32 %v2339_v19, %v2290_v60 }
 0x176   : > { %v4472_v5 = vsel %vm2229_vm6, %v2216_v54, %v2218_v29  ;;  %v2124_v54 = vrot.slane %v4402_v8, %v3273_v39  ;;  %v2090_v4 = vadd.f32 %v2081_v48, %v2032_v28  ;;  %v2370_v8 = vrot.slane %v4429_v49, %v3273_v39 }
 0x177   : > { %v2258_v51 = vrot.slane %v4472_v5, %v3264_v35  ;;  %v2316_v52 = vrot.slane %v4472_v5, %v3269_v37  ;;  %v2033_v7 = vadd.f32 %v2024_v57, %v4347_v45  ;;  %v2128_v45 = vrot.slane %v4447_v63, %v3273_v39 }
 0x178   : > { %v2139_v42 = vmul.f32 %v2124_v54, %v4254_v10  ;;  %v2374_v28 = vrot.slane %v4472_v5, %v3273_v39  ;;  %v2397_v54 = vmul.f32 %v2370_v8, %v4397_v62  ;;  %v2432_v6 = vrot.slane %v4472_v5, %v3277_v41 }
 0x179   : > { %v2282_v26 = vmul.f32 %v2258_v51, %v4352_v9  ;;  %v1966_v38 = vpop.permute.xlu1 %1965  ;;  %v2340_v27 = vmul.f32 %v2316_v52, %v4380_v34  ;;  %v2197_v51 = vmul.f32 %v2182_v50, %v4277_v11 }
 0x17a   : > { %v1968_v56 = vsel %vm1967_vm5, %v1964_v22, %v1966_v38  ;;  %v2428_v22 = vrot.slane %v4429_v49, %v3277_v41  ;;  %v2148_v57 = vadd.f32 %v2139_v42, %v2090_v4  ;;  %v2091_v49 = vadd.f32 %v2082_v21, %v2033_v7 }
 0x17b   : > { %v2016_v3 = vrot.slane %v1968_v56, %v3264_v35  ;;  %v2291_v25 = vadd.f32 %v2282_v26, %v4362_v17  ;;  %v2462_v17 = vadd.f32 %v2453_v55, %v2404_v16  ;;  %v2074_v32 = vrot.slane %v1968_v56, %v3269_v37 }
 0x17c   : > { %v2455_v18 = vmul.f32 %v2428_v22, %v4442_v0  ;;  %v2140_v26 = vmul.f32 %v2128_v45, %v4254_v10  ;;  %v2398_v16 = vmul.f32 %v2374_v28, %v4397_v62  ;;  %v4534_v4 = vadd.f32 %v2197_v51, %v2148_v57 }
 0x17d   : > { %v2220_v15 = vpop.permute.xlu1 %2219  ;;  %v2025_v46 = vmul.f32 %v2016_v3, %v4188_v36  ;;  %v2349_v48 = vadd.f32 %v2340_v27, %v2291_v25  ;;  %v2186_v36 = vrot.slane %v4447_v63, %v3277_v41  ;;  %v2406_v60 = vadd.f32 %v2397_v54, %v2348_v59  ;;  %v4537_v3 = vpop.permute.xlu0 %2560 }
 0x17e   : > { %v2234_v55 = vsel %vm2229_vm6, %v2218_v29, %v2220_v15  ;;  %v2149_v7 = vadd.f32 %v2140_v26, %v2091_v49  ;;  %v2132_v63 = vrot.slane %v1968_v56, %v3273_v39  ;;  %v2083_v31 = vmul.f32 %v2074_v32, %v4234_v14 }
 0x17f   : > { %v2034_v50 = vadd.f32 %v2025_v46, %v4372_v12  ;;  %v2407_v29 = vadd.f32 %v2398_v16, %v2349_v48  ;;  %v2190_v42 = vrot.slane %v1968_v56, %v3277_v41  ;;  %v2262_v5 = vrot.slane %v2234_v55, %v3264_v35 }
 0x180   : > { %v2198_v12 = vmul.f32 %v2186_v36, %v4277_v11  ;;  %v2320_v8 = vrot.slane %v2234_v55, %v3269_v37  ;;  %v2378_v25 = vrot.slane %v2234_v55, %v3273_v39  ;;  %v2456_v21 = vmul.f32 %v2432_v6, %v4442_v0 }
 0x181   : > { %v2222_v38 = vpop.permute.xlu1 %2221  ;;  %v2092_v45 = vadd.f32 %v2083_v31, %v2034_v50  ;;  %v4551_v56 = vadd.f32 %v2455_v18, %v2406_v60  ;;  %v2141_v51 = vmul.f32 %v2132_v63, %v4254_v10  ;;  %v2199_v59 = vmul.f32 %v2190_v42, %v4277_v11  ;;  %v4565_v18 = vpop.permute.xlu0 %2618 }
 0x182   : > { %v4532_v52 = vsel %vm2229_vm6, %v2220_v15, %v2222_v38  ;;  %v2436_v15 = vrot.slane %v2234_v55, %v3277_v41  ;;  %v4553_v27 = vadd.f32 %v2198_v12, %v2149_v7  ;;  %v4557_v57 = vadd.f32 %v2456_v21, %v2407_v29 }
 0x183   : > { %v2266_v19 = vrot.slane %v4532_v52, %v3264_v35  ;;  %v2283_v49 = vmul.f32 %v2262_v5, %v4352_v9  ;;  %v2341_v54 = vmul.f32 %v2320_v8, %v4380_v34  ;;  %v2399_v48 = vmul.f32 %v2378_v25, %v4397_v62 }
 0x184   : > { %v2150_v55 = vadd.f32 %v2141_v51, %v2092_v45  ;;  %v4569_v16 = vmul.f32 %v2436_v15, %v4442_v0  ;;  %v2324_v29 = vrot.slane %v4532_v52, %v3269_v37  ;;  %v2382_v31 = vrot.slane %v4532_v52, %v3273_v39 }
 0x185   : > { %v2472_v22 = vpop.permute.xlu1 %2471  ;;  %v2284_v32 = vmul.f32 %v2266_v19, %v4352_v9  ;;  %v2292_v63 = vadd.f32 %v2283_v49, %v4378_v58  ;;  %v2440_v42 = vrot.slane %v4532_v52, %v3277_v41  ;;  %v4594_v52 = vpop.permute.xlu0 %2676 }
 0x186   : > { %v2500_v14 = vsel %vm2491_vm7, %v2472_v22, %v2474_v1  ;;  %v4592_v21 = vadd.f32 %v2199_v59, %v2150_v55  ;;  %v2400_v49 = vmul.f32 %v2382_v31, %v4397_v62 }
 0x187   : > { %v2508_v28 = vrot.slane %v2500_v14, %v3264_v35  ;;  %v2566_v46 = vrot.slane %v2500_v14, %v3269_v37  ;;  %v2624_v10 = vrot.slane %v2500_v14, %v3273_v39  ;;  %v2682_v58 = vrot.slane %v2500_v14, %v3277_v41 }
 0x189   : > { %v2541_v26 = vmul.f32 %v2508_v28, %v4479_v40  ;;  %v2476_v36 = vpop.permute.xlu1 %2475  ;;  %v2599_v50 = vmul.f32 %v2566_v46, %v4537_v3  ;;  %v2657_v25 = vmul.f32 %v2624_v10, %v4565_v18  ;;  %v2350_v28 = vadd.f32 %v2341_v54, %v2292_v63 }
 0x18a   : > { %v2499_v11 = vsel %vm2491_vm7, %v2474_v1, %v2476_v36  ;;  %v2293_v1 = vadd.f32 %v2284_v32, %v4467_v24  ;;  %v2342_v46 = vmul.f32 %v2324_v29, %v4380_v34 }
 0x18b   : > { %v2550_v6 = vadd.f32 %v2541_v26, %v2462_v17  ;;  %v2512_v60 = vrot.slane %v2499_v11, %v3264_v35  ;;  %v2570_v7 = vrot.slane %v2499_v11, %v3269_v37  ;;  %v2628_v12 = vrot.slane %v2499_v11, %v3273_v39 }
 0x18c   : > { %v2686_v19 = vrot.slane %v2499_v11, %v3277_v41  ;;  %v2351_v55 = vadd.f32 %v2342_v46, %v2293_v1  ;;  %v2458_v1 = vmul.f32 %v2440_v42, %v4442_v0 }
 0x18d   : > { %v2608_v17 = vadd.f32 %v2599_v50, %v2550_v6  ;;  %v2542_v5 = vmul.f32 %v2512_v60, %v4479_v40  ;;  %v2224_v8 = vpop.permute.xlu1 %2223  ;;  %v2600_v45 = vmul.f32 %v2570_v7, %v4537_v3 }
 0x18e   : > { %v2232_v22 = vsel %vm2229_vm6, %v2222_v38, %v2224_v8  ;;  %v2658_v38 = vmul.f32 %v2628_v12, %v4565_v18  ;;  %v2716_v10 = vmul.f32 %v2686_v19, %v4594_v52  ;;  %v2408_v12 = vadd.f32 %v2399_v48, %v2350_v28 }
 0x18f   : > { %v2551_v24 = vadd.f32 %v2542_v5, %v4516_v23  ;;  %v2270_v15 = vrot.slane %v2232_v22, %v3264_v35  ;;  %v2666_v51 = vadd.f32 %v2657_v25, %v2608_v17  ;;  %v2328_v14 = vrot.slane %v2232_v22, %v3269_v37 }
 0x190   : > { %v2715_v23 = vmul.f32 %v2682_v58, %v4594_v52  ;;  %v2386_v50 = vrot.slane %v2232_v22, %v3273_v39  ;;  %v2444_v29 = vrot.slane %v2232_v22, %v3277_v41  ;;  %v2409_v25 = vadd.f32 %v2400_v49, %v2351_v55 }
 0x191   : > { %v2609_v32 = vadd.f32 %v2600_v45, %v2551_v24  ;;  %v2285_v59 = vmul.f32 %v2270_v15, %v4352_v9  ;;  %v2478_v26 = vpop.permute.xlu1 %2477  ;;  %v2343_v63 = vmul.f32 %v2328_v14, %v4380_v34 }
 0x192   : > { %v2498_v54 = vsel %vm2491_vm7, %v2476_v36, %v2478_v26  ;;  %v4611_v7 = vadd.f32 %v2715_v23, %v2666_v51  ;;  %v2401_v24 = vmul.f32 %v2386_v50, %v4397_v62  ;;  %v2459_v46 = vmul.f32 %v2444_v29, %v4442_v0 }
 0x193   : > { %v2667_v11 = vadd.f32 %v2658_v38, %v2609_v32  ;;  %v2294_v6 = vadd.f32 %v2285_v59, %v4534_v4  ;;  %v2516_v60 = vrot.slane %v2498_v54, %v3264_v35  ;;  %v2574_v31 = vrot.slane %v2498_v54, %v3269_v37 }
 0x194   : > { %v2632_v4 = vrot.slane %v2498_v54, %v3273_v39  ;;  %v2780_v15 = vmul.f32 %v4407_v13, %v4611_v7  ;;  %v2690_v48 = vrot.slane %v2498_v54, %v3277_v41  ;;  %v2466_v29 = vadd.f32 %v4569_v16, %v2408_v12  ;;  %v2484_v12 = vpop.permute.xlu0 %2483 }
 0x195   : > { %v4617_v17 = vadd.f32 %v2716_v10, %v2667_v11  ;;  %v2543_v36 = vmul.f32 %v2516_v60, %v4479_v40  ;;  %v2226_v5 = vpop.permute.xlu1 %2225  ;;  %v2352_v58 = vadd.f32 %v2343_v63, %v2294_v6  ;;  %v2601_v45 = vmul.f32 %v2574_v31, %v4537_v3 }
 0x196   : > { %v2231_v19 = vsel %vm2229_vm6, %v2224_v8, %v2226_v5  ;;  %v2659_v14 = vmul.f32 %v2632_v4, %v4565_v18  ;;  %v2717_v6 = vmul.f32 %v2690_v48, %v4594_v52  ;;  %v2467_v31 = vadd.f32 %v2458_v1, %v2409_v25 }
 0x197   : > { %v2552_v22 = vadd.f32 %v2543_v36, %v4551_v56  ;;  %v2274_v42 = vrot.slane %v2231_v19, %v3264_v35  ;;  %v2332_v28 = vrot.slane %v2231_v19, %v3269_v37  ;;  %v2781_v8 = vmul.f32 %v4411_v61, %v4617_v17 }
 0x198   : > { %v2410_v32 = vadd.f32 %v2401_v24, %v2352_v58  ;;  %v2390_v59 = vrot.slane %v2231_v19, %v3273_v39  ;;  %v2448_v50 = vrot.slane %v2231_v19, %v3277_v41 }
 0x199   : > { %v2610_v51 = vadd.f32 %v2601_v45, %v2552_v22  ;;  %v2286_v56 = vmul.f32 %v2274_v42, %v4352_v9  ;;  %v2480_v49 = vpop.permute.xlu1 %2479  ;;  %v2344_v38 = vmul.f32 %v2332_v28, %v4380_v34 }
 0x19a   : > { %v2497_v55 = vsel %vm2491_vm7, %v2478_v26, %v2480_v49  ;;  %v4651_v58 = vadd.f32 %v2459_v46, %v2410_v32  ;;  %v2402_v22 = vmul.f32 %v2390_v59, %v4397_v62  ;;  %v2460_v25 = vmul.f32 %v2448_v50, %v4442_v0 }
 0x19b   : > { %v2668_v23 = vadd.f32 %v2659_v14, %v2610_v51  ;;  %v2295_v10 = vadd.f32 %v2286_v56, %v4553_v27  ;;  %v2520_v54 = vrot.slane %v2497_v55, %v3264_v35  ;;  %v2578_v11 = vrot.slane %v2497_v55, %v3269_v37 }
 0x19c   : > { %v2636_v60 = vrot.slane %v2497_v55, %v3273_v39  ;;  %v2694_v63 = vrot.slane %v2497_v55, %v3277_v41  ;;  %v4649_v27 = vadd.f32 %v2781_v8, %v2780_v15 }
 0x19d   : > { %v2353_v36 = vadd.f32 %v2344_v38, %v2295_v10  ;;  %v2544_v26 = vmul.f32 %v2520_v54, %v4479_v40  ;;  %v2228_v4 = vpop.permute.xlu1 %2227  ;;  %v4653_v24 = vadd.f32 %v2717_v6, %v2668_v23  ;;  %v2602_v16 = vmul.f32 %v2578_v11, %v4537_v3 }
 0x19e   : > { %v2230_v19 = vsel %vm2229_vm6, %v2226_v5, %v2228_v4  ;;  %v2660_v42 = vmul.f32 %v2636_v60, %v4565_v18  ;;  %v2718_v15 = vmul.f32 %v2694_v63, %v4594_v52  ;;  %v2488_v60 = vpop.permute.xlu0 %2487 }
 0x19f   : > { %v2553_v45 = vadd.f32 %v2544_v26, %v4557_v57  ;;  %v2278_v1 = vrot.slane %v2230_v19, %v3264_v35  ;;  %v2336_v46 = vrot.slane %v2230_v19, %v3269_v37  ;;  %v2411_v48 = vadd.f32 %v2402_v22, %v2353_v36 }
 0x1a0   : > { %v2394_v8 = vrot.slane %v2230_v19, %v3273_v39  ;;  %v4669_v51 = vmul.f32 %v4418_v20, %v4653_v24  ;;  %v2452_v56 = vrot.slane %v2230_v19, %v3277_v41 }
 0x1a1   : > { %v2611_v28 = vadd.f32 %v2602_v16, %v2553_v45  ;;  %v2287_v5 = vmul.f32 %v2278_v1, %v4352_v9  ;;  %v2482_v57 = vpop.permute.xlu1 %2481  ;;  %v2345_v14 = vmul.f32 %v2336_v46, %v4380_v34  ;;  %v2469_v11 = vadd.f32 %v2460_v25, %v2411_v48 }
 0x1a2   : > { %v2495_v32 = vsel %vm2491_vm7, %v2482_v57, %v2484_v12  ;;  %v2496_v9 = vsel %vm2491_vm7, %v2480_v49, %v2482_v57  ;;  %v2403_v50 = vmul.f32 %v2394_v8, %v4397_v62  ;;  %v2461_v36 = vmul.f32 %v2452_v56, %v4442_v0 }
 0x1a3   : > { %v2669_v38 = vadd.f32 %v2660_v42, %v2611_v28  ;;  %v2296_v59 = vadd.f32 %v2287_v5, %v4592_v21  ;;  %v2528_v55 = vrot.slane %v2495_v32, %v3264_v35  ;;  %v2524_v23 = vrot.slane %v2496_v9, %v3264_v35 }
 0x1a4   : > { %v2582_v10 = vrot.slane %v2496_v9, %v3269_v37  ;;  %v2586_v54 = vrot.slane %v2495_v32, %v3269_v37  ;;  %v2640_v34 = vrot.slane %v2496_v9, %v3273_v39  ;;  %v2644_v4 = vrot.slane %v2495_v32, %v3273_v39 }
 0x1a5   : > { %v4683_v6 = vadd.f32 %v2718_v15, %v2669_v38  ;;  %v2546_v21 = vmul.f32 %v2528_v55, %v4479_v40  ;;  %v2486_v63 = vpop.permute.xlu1 %2485  ;;  %v2354_v49 = vadd.f32 %v2345_v14, %v2296_v59  ;;  %v2545_v26 = vmul.f32 %v2524_v23, %v4479_v40 }
 0x1a6   : > { %v2603_v22 = vmul.f32 %v2582_v10, %v4537_v3  ;;  %v2604_v45 = vmul.f32 %v2586_v54, %v4537_v3  ;;  %v2661_v16 = vmul.f32 %v2640_v34, %v4565_v18  ;;  %v2698_v25 = vrot.slane %v2496_v9, %v3277_v41 }
 0x1a7   : > { %v2555_v19 = vadd.f32 %v2546_v21, %v2467_v31  ;;  %v2783_v62 = vmul.f32 %v4422_v30, %v4683_v6  ;;  %v2554_v1 = vadd.f32 %v2545_v26, %v2466_v29  ;;  %v2493_v0 = vsel %vm2491_vm7, %v2486_v63, %v2488_v60 }
 0x1a8   : > { %v2702_v15 = vrot.slane %v2495_v32, %v3277_v41  ;;  %v2494_v31 = vsel %vm2491_vm7, %v2484_v12, %v2486_v63  ;;  %v2536_v46 = vrot.slane %v2493_v0, %v3264_v35  ;;  %v2412_v48 = vadd.f32 %v2403_v50, %v2354_v49 }
 0x1a9   : > { %v2613_v42 = vadd.f32 %v2604_v45, %v2555_v19  ;;  %v2612_v28 = vadd.f32 %v2603_v22, %v2554_v1  ;;  %v2662_v5 = vmul.f32 %v2644_v4, %v4565_v18  ;;  %v2532_v8 = vrot.slane %v2494_v31, %v3264_v35  ;;  %v2490_v9 = vpop.permute.xlu1 %2489 }
 0x1aa   : > { %v2719_v29 = vmul.f32 %v2698_v25, %v4594_v52  ;;  %v2548_v57 = vmul.f32 %v2536_v46, %v4479_v40  ;;  %v2590_v14 = vrot.slane %v2494_v31, %v3269_v37  ;;  %v2594_v56 = vrot.slane %v2493_v0, %v3269_v37 }
 0x1ab   : > { %v2670_v32 = vadd.f32 %v2661_v16, %v2612_v28  ;;  %v2547_v38 = vmul.f32 %v2532_v8, %v4479_v40  ;;  %v2648_v12 = vrot.slane %v2494_v31, %v3273_v39  ;;  %v2652_v59 = vrot.slane %v2493_v0, %v3273_v39 }
 0x1ac   : > { %v2671_v55 = vadd.f32 %v2662_v5, %v2613_v42  ;;  %v2720_v23 = vmul.f32 %v2702_v15, %v4594_v52  ;;  %v2557_v10 = vadd.f32 %v2548_v57, %v2469_v11  ;;  %v2606_v54 = vmul.f32 %v2594_v56, %v4537_v3 }
 0x1ad   : > { %v2728_v34 = vadd.f32 %v2719_v29, %v2670_v32  ;;  %v2556_v50 = vadd.f32 %v2547_v38, %v4651_v58  ;;  %v2605_v21 = vmul.f32 %v2590_v14, %v4537_v3  ;;  %v2664_v63 = vmul.f32 %v2652_v59, %v4565_v18 }
 0x1ae   : > { %v2615_v49 = vadd.f32 %v2606_v54, %v2557_v10  ;;  %v2706_v26 = vrot.slane %v2494_v31, %v3277_v41  ;;  %v2710_v4 = vrot.slane %v2493_v0, %v3277_v41  ;;  %v2492_v19 = vsel %vm2491_vm7, %v2488_v60, %v2490_v9 }
 0x1af   : > { %v2614_v22 = vadd.f32 %v2605_v21, %v2556_v50  ;;  %v2663_v11 = vmul.f32 %v2648_v12, %v4565_v18  ;;  %v2540_v45 = vrot.slane %v2492_v19, %v3264_v35  ;;  %v2598_v16 = vrot.slane %v2492_v19, %v3269_v37 }
 0x1b0   : > { %v2470_v58 = vadd.f32 %v2461_v36, %v2412_v48  ;;  %v2656_v1 = vrot.slane %v2492_v19, %v3273_v39  ;;  %v2673_v25 = vadd.f32 %v2664_v63, %v2615_v49  ;;  %v2790_v42 = vadd.f32 %v4649_v27, %v4669_v51 }
 0x1b1   : > { %v2729_v15 = vadd.f32 %v2720_v23, %v2671_v55  ;;  %v2672_v31 = vadd.f32 %v2663_v11, %v2614_v22  ;;  %v2721_v0 = vmul.f32 %v2706_v26, %v4594_v52  ;;  %v2549_v43 = vmul.f32 %v2540_v45, %v4479_v40 }
 0x1b2   : > { %v2722_v60 = vmul.f32 %v2710_v4, %v4594_v52  ;;  %v2714_v46 = vrot.slane %v2492_v19, %v3277_v41  ;;  %v2784_v35 = vmul.f32 %v4435_v53, %v2728_v34  ;;  %v2607_v36 = vmul.f32 %v2598_v16, %v4537_v3  ;;  %v2940_v3 = vld [vmem:[%s4766_s3 + $0x8] ss:$0 sm:$0xff] }
 0x1b3   : > { %v2558_v37 = vadd.f32 %v2549_v43, %v2470_v58  ;;  %v2730_v39 = vadd.f32 %v2721_v0, %v2672_v31  ;;  %v2791_v48 = vadd.f32 %v2790_v42, %v2783_v62  ;;  %v2665_v28 = vmul.f32 %v2656_v1, %v4565_v18 }
 0x1b4   : > { %v2731_v27 = vadd.f32 %v2722_v60, %v2673_v25  ;;  %v2766_v51 = vrot.slane %v4393_v47, %v4778_v2  ;;  %v2785_v40 = vmul.f32 %v4439_v44, %v2729_v15  ;;  %v2723_v57 = vmul.f32 %v2714_v46, %v4594_v52 }
 0x1b5   : > { %v2616_v5 = vadd.f32 %v2607_v36, %v2558_v37  ;;  %v2786_v8 = vmul.f32 %v4465_v33, %v2730_v39  ;;  %v2792_v29 = vadd.f32 %v2791_v48, %v2784_v35 }
 0x1b6   : > { %v2787_v18 = vmul.f32 %v2766_v51, %v2731_v27 }
 0x1b7   : > { %v2674_v41 = vadd.f32 %v2665_v28, %v2616_v5  ;;  %v2793_v14 = vadd.f32 %v2792_v29, %v2785_v40 }
 0x1b9   : > { %v2732_v62 = vadd.f32 %v2723_v57, %v2674_v41  ;;  %v2794_v56 = vadd.f32 %v2793_v14, %v2786_v8 }
 0x1bb   : > { %v2788_v32 = vmul.f32 %v2940_v3, %v2732_v62  ;;  %v2795_v38 = vadd.f32 %v2794_v56, %v2787_v18 }
 0x1bd   : > { %v2796_v2 = vadd.f32 %v2795_v38, %v2788_v32 }
 0x1bf   : > { %2797 = vadd.xlane.f32.xlu0 %v2796_v2 }
 0x248   : > { %v2798_v47 = vpop.xlane.xlu0 %2797 }
 0x249   : > { %v2799_v12 = vmul.f32 0.0009765625, %v2798_v47 }
 0x24b   : > { %v2800_v59 = vsub.f32 %v4611_v7, %v2799_v12  ;;  %v2801_v9 = vsub.f32 %v4617_v17, %v2799_v12  ;;  %v2802_v52 = vsub.f32 %v4653_v24, %v2799_v12  ;;  %v2803_v55 = vsub.f32 %v4683_v6, %v2799_v12 }
 0x24c   : > { %v2804_v23 = vsub.f32 %v2728_v34, %v2799_v12  ;;  %v2805_v21 = vsub.f32 %v2729_v15, %v2799_v12  ;;  %v2806_v4 = vsub.f32 %v2730_v39, %v2799_v12  ;;  %v2807_v17 = vsub.f32 %v2731_v27, %v2799_v12 }
 0x24d   : > { %v2809_v10 = vmul.f32 %v2800_v59, %v2800_v59  ;;  %v2810_v54 = vmul.f32 %v2801_v9, %v2801_v9  ;;  %v2811_v50 = vmul.f32 %v2802_v52, %v2802_v52  ;;  %v2812_v63 = vmul.f32 %v2803_v55, %v2803_v55 }
 0x24e   : > { %v2813_v19 = vmul.f32 %v2804_v23, %v2804_v23  ;;  %v2814_v11 = vmul.f32 %v2805_v21, %v2805_v21  ;;  %v2808_v34 = vsub.f32 %v2732_v62, %v2799_v12  ;;  %v2815_v45 = vmul.f32 %v2806_v4, %v2806_v4 }
 0x24f   : > { %v2818_v49 = vmul.f32 %v2809_v10, %v4407_v13  ;;  %v2819_v26 = vmul.f32 %v2810_v54, %v4411_v61  ;;  %v2820_v7 = vmul.f32 %v2811_v50, %v4418_v20  ;;  %v2821_v24 = vmul.f32 %v2812_v63, %v4422_v30 }
 0x250   : > { %v2822_v16 = vmul.f32 %v2813_v19, %v4435_v53  ;;  %v2816_v1 = vmul.f32 %v2807_v17, %v2807_v17  ;;  %v2823_v13 = vmul.f32 %v2814_v11, %v4439_v44  ;;  %v2817_v61 = vmul.f32 %v2808_v34, %v2808_v34  ;;  %v201_v53 = vld [vmem:[%s4765_s2] sm:$0xff] }
 0x251   : > { %v2827_v22 = vadd.f32 %v2819_v26, %v2818_v49  ;;  %v2824_v42 = vmul.f32 %v2815_v45, %v4465_v33  ;;  %v4782_v33 = vmov 1  }
 0x252   : > { %v2825_v20 = vmul.f32 %v2816_v1, %v2766_v51  ;;  %v2826_v0 = vmul.f32 %v2940_v3, %v2817_v61 }
 0x253   : > { %v2828_v6 = vadd.f32 %v2827_v22, %v2820_v7 }
 0x255   : > { %v2829_v58 = vadd.f32 %v2828_v6, %v2821_v24 }
 0x257   : > { %v2830_v25 = vadd.f32 %v2829_v58, %v2822_v16 }
 0x259   : > { %v2831_v15 = vadd.f32 %v2830_v25, %v2823_v13 }
 0x25b   : > { %v2832_v31 = vadd.f32 %v2831_v15, %v2824_v42 }
 0x25d   : > { %v2833_v43 = vadd.f32 %v2832_v31, %v2825_v20 }
 0x25f   : > { %v2834_v30 = vadd.f32 %v2833_v43, %v2826_v0 }
 0x261   : > { %2835 = vadd.xlane.f32.xlu1 %v2834_v30 }
 0x272   : > { %2857 = vperm.xlu1 %3034, %v201_v53  }
 0x2ea   : > { %v2836_v60 = vpop.xlane.xlu1 %2835 }
 0x2eb   : > { %v2837_v46 = vmul.f32 0.0009765625, %v2836_v60 }
 0x2ed   : > { %v2838_v44 = vadd.f32 1e-05, %v2837_v46 }
 0x2ee   : > { %v2858_v39 = vpop.permute.xlu1 %2857 }
 0x2ef   : > { %3041 = vrsqrt.f32 %v2838_v44 }
 0x2fc   : > { %v3042_v35 = vpop.eup %3041 }
 0x2fd   : > { %v2840_v37 = vmul.f32 %v3042_v35, %v201_v53 }
 0x2ff   : > { %2843 = vperm.xlu0 %3033, %v2840_v37  }
 0x303   : > { %3035 = vset.pattern.permute.xlu0 %v4782_v33 }
 0x37a   : > { %v2844_v36 = vpop.permute.xlu0 %2843 }
 0x37b   : > { %v2846_v48 = vmul.f32 %v2844_v36, %v2800_v59  ;;  %v2847_v28 = vmul.f32 %v2844_v36, %v2801_v9  ;;  %v2848_v27 = vmul.f32 %v2844_v36, %v2802_v52  ;;  %v2849_v51 = vmul.f32 %v2844_v36, %v2803_v55 }
 0x37c   : > { %v2850_v5 = vmul.f32 %v2844_v36, %v2804_v23  ;;  %v2851_v40 = vmul.f32 %v2844_v36, %v2805_v21  ;;  %v2852_v8 = vmul.f32 %v2844_v36, %v2806_v4  ;;  %v2853_v29 = vmul.f32 %v2844_v36, %v2807_v17 }
 0x37d   : > { %v2854_v41 = vmul.f32 %v2844_v36, %v2808_v34  ;;  %v2860_v57 = vadd.f32 %v2858_v39, %v2846_v48  ;;  %v2861_v14 = vadd.f32 %v2858_v39, %v2847_v28  ;;  %v2862_v3 = vadd.f32 %v2858_v39, %v2848_v27 }
 0x37e   : > { %v2863_v62 = vadd.f32 %v2858_v39, %v2849_v51  ;;  %v2864_v18 = vadd.f32 %v2858_v39, %v2850_v5  ;;  %v2865_v56 = vadd.f32 %v2858_v39, %v2851_v40  ;;  %v2866_v32 = vadd.f32 %v2858_v39, %v2852_v8 }
 0x37f   : > { %v2867_v38 = vadd.f32 %v2858_v39, %v2853_v29  ;;  %v2868_v2 = vadd.f32 %v2858_v39, %v2854_v41  ;;  %2869 = vst [vmem:[%s197_s14] sm:$0xff] %v2860_v57  ;;  %2870 = vst [vmem:[%s197_s14 + $0x8] sm:$0xff] %v2861_v14 }
 0x380   : > { %2871 = vst [vmem:[%s197_s14 + $0x10] sm:$0xff] %v2862_v3  ;;  %2872 = vst [vmem:[%s197_s14 + $0x18] sm:$0xff] %v2863_v62 }
 0x381   : > { %2873 = vst [vmem:[%s197_s14 + $0x20] sm:$0xff] %v2864_v18  ;;  %2874 = vst [vmem:[%s197_s14 + $0x28] sm:$0xff] %v2865_v56 }
 0x382   : > { %2875 = vst [vmem:[%s197_s14 + $0x30] sm:$0xff] %v2866_v32  ;;  %2876 = vst [vmem:[%s197_s14 + $0x38] sm:$0xff] %v2867_v38 }
 0x383   : > { %2877 = vst [vmem:[%s197_s14 + $0x40] sm:$0xff] %v2868_v2 }
 0x384 PF: > { %s14_s15 = sadd.s32 1, %s3054_s15  }
 0x385   : > { %p11_p4 = scmp.ge.s32.totalorder %s14_s15, 4  }
 0x387   :  { %13 = sbr.rel (!%p11_p4) target bundleno = 1 (0x1), region = 66 }

</bundles_post_ra>
